<compile_context>
chip_gen: v5e
topology: v5e:2x2
jax: 0.10.0
libtpu: 0.0.40
codegen_flags: <defaults>
</compile_context>

<pallas_src>
import numpy as np
import jax
import jax.numpy as jnp
from jax import lax
from jax.experimental import pallas as pl
from jax.experimental.pallas import tpu as pltpu

EPS = 1e-5
OUT_PAD = 128   # lane-dense padded width for the final logits store


# ----------------------------------------------------------------------------
# Constant preprocessing (pure XLA glue on the parameters)
# ----------------------------------------------------------------------------
def conv_band_weights(w, W):
    """(Cout,Cin,3,3) conv weights -> (KH, (W+2)*Cin, W*Cout) banded matrices.

    Multiplying a padded input row slab (lane index = p*Cin + cin) by band[dy]
    and summing over dy performs the full 3x3 convolution; the result's lane
    index is x*Cout + cout."""
    Cout, Cin, KH, KW = w.shape
    Wp = W + 2
    xp = jnp.arange(Wp)[:, None]
    x = jnp.arange(W)[None, :]
    ind = jnp.stack([(xp == x + dx).astype(w.dtype) for dx in range(KW)])   # (KW,Wp,W)
    wt = jnp.transpose(w, (2, 3, 1, 0))                                     # (KH,KW,Cin,Cout)
    band = jnp.einsum('kpx,dkio->dpixo', ind, wt)                           # (KH,Wp,Cin,W,Cout)
    return band.reshape(KH, Wp * Cin, W * Cout)


def row_pool_mats(H, pad):
    """0/1 row-pick matrices (2, H//2 + 2*pad, H) for the 2x2 max-pool rows.
    pad=1 also emits zero top/bottom rows (= next conv's row padding)."""
    Hout = H // 2
    rows = jnp.arange(Hout + 2 * pad)[:, None]
    cols = jnp.arange(H)[None, :]
    return jnp.stack([(cols == 2 * (rows - pad) + off).astype(jnp.float32)
                      for off in range(2)])


def col_pool_mats(W, C, pad):
    """0/1 column-pick matrices (2, W*C, (W//2 + 2*pad)*C) for the 2x2 max-pool
    columns in the pixel-major / channel-minor lane layout.  pad=1 also emits
    zero channel groups at both ends (= next conv's column padding)."""
    Wout = W // 2
    i = jnp.arange(W * C)
    j = jnp.arange((Wout + 2 * pad) * C)
    xi, ci = i // C, i % C
    xo, co = j // C, j % C
    mats = []
    for off in range(2):
        sel = (ci[:, None] == co[None, :]) & \
              (xi[:, None] == 2 * (xo[None, :] - pad) + off)
        mats.append(sel.astype(jnp.float32))
    return jnp.stack(mats)


# ----------------------------------------------------------------------------
# Fused kernel: all conv blocks + FC head for one image per grid step
# ----------------------------------------------------------------------------
def make_fused_kernel(num_blocks, fc_rows):
    def kernel(*refs):
        x_ref = refs[0]
        out_ref = refs[-1]
        conv_refs = refs[1:1 + 4 * num_blocks]
        w1_ref, stfc_ref, w2_ref, b2_ref = refs[1 + 4 * num_blocks:-1]

        a = x_ref[0]                               # (Hp, Wp*Cin) padded slab
        for b in range(num_blocks):
            wb_ref, st_ref, q_ref, p_ref = conv_refs[4 * b:4 * b + 4]
            KH = wb_ref.shape[0]
            H = q_ref.shape[2]                     # conv-output rows

            # 3x3 conv (padding=1) as KH banded MXU matmuls on shifted slabs
            acc = jnp.dot(a[0:H, :], wb_ref[0],
                          preferred_element_type=jnp.float32)
            for dy in range(1, KH):
                acc = acc + jnp.dot(a[dy:dy + H, :], wb_ref[dy],
                                    preferred_element_type=jnp.float32)
            # folded BatchNorm2d (+ conv bias) and ReLU
            acc = jnp.maximum(acc * st_ref[0:1, :] + st_ref[1:2, :], 0.0)
            # 2x2 max-pool via exact 0/1 pick matmuls (all channels at once);
            # for every block but the last these also produce the next conv's
            # zero padding (rows and channel-group columns).
            rows = jnp.maximum(
                jnp.dot(q_ref[0], acc, preferred_element_type=jnp.float32),
                jnp.dot(q_ref[1], acc, preferred_element_type=jnp.float32))
            a = jnp.maximum(
                jnp.dot(rows, p_ref[0], preferred_element_type=jnp.float32),
                jnp.dot(rows, p_ref[1], preferred_element_type=jnp.float32))

        # FC head: Linear -> folded BN1d -> ReLU -> Linear (lane-padded output)
        h = jnp.dot(a[0:1, :], w1_ref[0], preferred_element_type=jnp.float32)
        for r in range(1, fc_rows):                # contraction over HWC rows
            h = h + jnp.dot(a[r:r + 1, :], w1_ref[r],
                            preferred_element_type=jnp.float32)
        h = jnp.maximum(h * stfc_ref[0:1, :] + stfc_ref[1:2, :], 0.0)
        out_ref[0] = jnp.dot(h, w2_ref[...],
                             preferred_element_type=jnp.float32) + b2_ref[...]

    return kernel


# ----------------------------------------------------------------------------
# Wrapper: build constants, call the fused kernel once
# ----------------------------------------------------------------------------
def conv_mnist_forward(x, params):
    """x: (N, Cin, H, W) float32 -> logits (N, output_size)."""
    N, Cin0, Hin, Win = x.shape
    blocks = params["conv_blocks"]
    fc = params["fc"]

    # input NCHW -> zero-padded channel-minor slab (N, Hin+2, (Win+2)*Cin)
    xh = jnp.transpose(x, (0, 2, 3, 1)).astype(jnp.float32)
    xh = jnp.pad(xh, ((0, 0), (1, 1), (1, 1), (0, 0)))
    xp = xh.reshape(N, Hin + 2, (Win + 2) * Cin0)

    def full_spec(shape):                 # whole array resident in VMEM
        nd = len(shape)
        return pl.BlockSpec(shape, lambda n, _nd=nd: (0,) * _nd)

    in_specs = [pl.BlockSpec((1, Hin + 2, (Win + 2) * Cin0),
                             lambda n: (n, 0, 0))]
    const_args = []
    h, w = Hin, Win
    for bi, p in enumerate(blocks):
        cout = p["w"].shape[0]
        pad_next = 1 if bi < len(blocks) - 1 else 0
        wb = conv_band_weights(p["w"].astype(jnp.float32), w)
        scale = p["gamma"] / jnp.sqrt(p["var"] + EPS)
        shift = (p["b"] - p["mean"]) * scale + p["beta"]
        st = jnp.stack([jnp.tile(scale, w), jnp.tile(shift, w)])
        q = row_pool_mats(h, pad_next)
        pm = col_pool_mats(w, cout, pad_next)
        for t in (wb, st, q, pm):
            const_args.append(t)
            in_specs.append(full_spec(t.shape))
        h //= 2
        w //= 2

    c_last = blocks[-1]["w"].shape[0]
    hid = fc["w1"].shape[1]
    out_size = fc["w2"].shape[1]
    # permute FC1 rows from PyTorch's CHW flatten order to the kernel's HWC order
    w1k = (fc["w1"].reshape(c_last, h, w, hid)
           .transpose(1, 2, 0, 3).reshape(h, w * c_last, hid))
    s1 = fc["gamma1"] / jnp.sqrt(fc["var1"] + EPS)
    t1 = (fc["b1"] - fc["mean1"]) * s1 + fc["beta1"]
    stfc = jnp.stack([s1, t1])
    w2p = jnp.zeros((hid, OUT_PAD), jnp.float32).at[:, :out_size].set(fc["w2"])
    b2p = jnp.zeros((1, OUT_PAD), jnp.float32).at[:, :out_size].set(fc["b2"][None, :])
    for t in (w1k, stfc, w2p, b2p):
        const_args.append(t)
        in_specs.append(full_spec(t.shape))

    kernel = make_fused_kernel(len(blocks), h)
    out = pl.pallas_call(
        kernel,
        out_shape=jax.ShapeDtypeStruct((N, 1, OUT_PAD), jnp.float32),
        grid=(N,),
        in_specs=in_specs,
        out_specs=pl.BlockSpec((1, 1, OUT_PAD), lambda n: (n, 0, 0)),
        compiler_params=pltpu.CompilerParams(
            dimension_semantics=("parallel",)),
    )(xp, *const_args)
    return out.reshape(N, OUT_PAD)[:, :out_size]


# ----------------------------------------------------------------------------
# Parameter init (matches the PyTorch _initialize_weights, eval-mode BN stats)
# ----------------------------------------------------------------------------
def init_params(key, conv_channels, hidden_size, output_size, in_hw=28):
    # TODO(synk): only a single hidden FC layer (len(hidden_size) == 1) is
    # implemented, as used in the demo configuration below.
    ks = jax.random.split(key, 4)
    ki = iter(ks)
    params = {"conv_blocks": []}
    cin, hw = 1, in_hw
    for cout in conv_channels:
        std = float(np.sqrt(2.0 / (cout * 9)))      # kaiming_normal_, fan_out
        wconv = jax.random.normal(next(ki), (cout, cin, 3, 3), jnp.float32) * std
        params["conv_blocks"].append(dict(
            w=wconv, b=jnp.zeros((cout,), jnp.float32),
            gamma=jnp.ones((cout,), jnp.float32),
            beta=jnp.zeros((cout,), jnp.float32),
            mean=jnp.zeros((cout,), jnp.float32),
            var=jnp.ones((cout,), jnp.float32)))
        cin = cout
        hw //= 2
    flattened = cin * hw * hw
    h1 = hidden_size[0]
    a1 = float(np.sqrt(6.0 / (flattened + h1)))     # xavier_uniform_
    w1 = jax.random.uniform(next(ki), (flattened, h1), jnp.float32, -a1, a1)
    a2 = float(np.sqrt(6.0 / (h1 + output_size)))
    w2 = jax.random.uniform(next(ki), (h1, output_size), jnp.float32, -a2, a2)
    params["fc"] = dict(
        w1=w1, b1=jnp.zeros((h1,), jnp.float32),
        gamma1=jnp.ones((h1,), jnp.float32),
        beta1=jnp.zeros((h1,), jnp.float32),
        mean1=jnp.zeros((h1,), jnp.float32),
        var1=jnp.ones((h1,), jnp.float32),
        w2=w2, b2=jnp.zeros((output_size,), jnp.float32))
    return params


# ----------------------------------------------------------------------------
# Pure-JAX reference (correctness check only)
# ----------------------------------------------------------------------------
def reference_forward(x, params):
    y = x
    for p in params["conv_blocks"]:
        y = lax.conv_general_dilated(
            y, p["w"], (1, 1), ((1, 1), (1, 1)),
            dimension_numbers=("NCHW", "OIHW", "NCHW"),
            precision=lax.Precision.HIGHEST)
        y = y + p["b"][None, :, None, None]
        s = p["gamma"] / jnp.sqrt(p["var"] + EPS)
        y = (y - p["mean"][None, :, None, None]) * s[None, :, None, None] \
            + p["beta"][None, :, None, None]
        y = jnp.maximum(y, 0.0)
        y = lax.reduce_window(y, -jnp.inf, lax.max,
                              (1, 1, 2, 2), (1, 1, 2, 2), "VALID")
    yf = y.reshape(y.shape[0], -1)
    fc = params["fc"]
    h = jnp.dot(yf, fc["w1"], precision=lax.Precision.HIGHEST) + fc["b1"]
    s1 = fc["gamma1"] / jnp.sqrt(fc["var1"] + EPS)
    h = (h - fc["mean1"]) * s1 + fc["beta1"]
    h = jnp.maximum(h, 0.0)
    return jnp.dot(h, fc["w2"], precision=lax.Precision.HIGHEST) + fc["b2"]


# TODO(synk): training / validation utilities (training_step, accuracy, epoch
# loops) are host-side orchestration, not kernel compute, and are omitted.

if __name__ == "__main__":
    key = jax.random.PRNGKey(0)
    kx, kp = jax.random.split(key)

    # small-but-faithful configuration: MNIST-shaped input (28x28x1),
    # conv_channels=[8, 16], hidden_size=[32], output_size=10, batch=2.
    conv_channels = [8, 16]
    hidden_size = [32]
    output_size = 10
    N = 2

    x = jax.random.normal(kx, (N, 1, 28, 28), jnp.float32)
    params = init_params(kp, conv_channels, hidden_size, output_size)

    fwd = jax.jit(conv_mnist_forward)
    out = jax.block_until_ready(fwd(x, params))
    ref = jax.block_until_ready(reference_forward(x, params))

    assert out.shape == (N, output_size), out.shape
    np.testing.assert_allclose(np.asarray(out), np.asarray(ref),
                               rtol=2e-3, atol=2e-3)
    print("KERNEL_OK")
</pallas_src>

<mosaic_0001>
module attributes {stable_mosaic.version = 11 : i64} {
  func.func @kernel(%arg0: i32, %arg1: memref<1x30x30xf32, #tpu.memory_space<vmem>>, %arg2: memref<3x30x224xf32, #tpu.memory_space<vmem>>, %arg3: memref<2x224xf32, #tpu.memory_space<vmem>>, %arg4: memref<2x16x28xf32, #tpu.memory_space<vmem>>, %arg5: memref<2x224x128xf32, #tpu.memory_space<vmem>>, %arg6: memref<3x128x224xf32, #tpu.memory_space<vmem>>, %arg7: memref<2x224xf32, #tpu.memory_space<vmem>>, %arg8: memref<2x7x14xf32, #tpu.memory_space<vmem>>, %arg9: memref<2x224x112xf32, #tpu.memory_space<vmem>>, %arg10: memref<7x112x32xf32, #tpu.memory_space<vmem>>, %arg11: memref<2x32xf32, #tpu.memory_space<vmem>>, %arg12: memref<32x128xf32, #tpu.memory_space<vmem>>, %arg13: memref<1x128xf32, #tpu.memory_space<vmem>>, %arg14: memref<1x1x128xf32, #tpu.memory_space<vmem>>) attributes {dimension_semantics = [#tpu.dimension_semantics<parallel>], iteration_bounds = array<i64: 2>, scalar_prefetch = 0 : i64, scratch_operands = 0 : i64, tpu.core_type = #tpu.core_type<tc>, window_params = [{transform_indices = @transform_0, window_bounds = array<i64: 1, 30, 30>}, {pipeline_mode = #tpu.pipeline_mode<synchronous>, transform_indices = @transform_1, window_bounds = array<i64: 3, 30, 224>}, {pipeline_mode = #tpu.pipeline_mode<synchronous>, transform_indices = @transform_2, window_bounds = array<i64: 2, 224>}, {pipeline_mode = #tpu.pipeline_mode<synchronous>, transform_indices = @transform_3, window_bounds = array<i64: 2, 16, 28>}, {pipeline_mode = #tpu.pipeline_mode<synchronous>, transform_indices = @transform_4, window_bounds = array<i64: 2, 224, 128>}, {pipeline_mode = #tpu.pipeline_mode<synchronous>, transform_indices = @transform_5, window_bounds = array<i64: 3, 128, 224>}, {pipeline_mode = #tpu.pipeline_mode<synchronous>, transform_indices = @transform_6, window_bounds = array<i64: 2, 224>}, {pipeline_mode = #tpu.pipeline_mode<synchronous>, transform_indices = @transform_7, window_bounds = array<i64: 2, 7, 14>}, {pipeline_mode = #tpu.pipeline_mode<synchronous>, transform_indices = @transform_8, window_bounds = array<i64: 2, 224, 112>}, {pipeline_mode = #tpu.pipeline_mode<synchronous>, transform_indices = @transform_9, window_bounds = array<i64: 7, 112, 32>}, {pipeline_mode = #tpu.pipeline_mode<synchronous>, transform_indices = @transform_10, window_bounds = array<i64: 2, 32>}, {pipeline_mode = #tpu.pipeline_mode<synchronous>, transform_indices = @transform_11, window_bounds = array<i64: 32, 128>}, {pipeline_mode = #tpu.pipeline_mode<synchronous>, transform_indices = @transform_12, window_bounds = array<i64: 1, 128>}, {transform_indices = @transform_13, window_bounds = array<i64: 1, 1, 128>}]} {
    %c0 = arith.constant 0 : index
    %c0_0 = arith.constant 0 : index
    %c0_1 = arith.constant 0 : index
    %0 = vector.load %arg1[%c0, %c0_0, %c0_1] : memref<1x30x30xf32, #tpu.memory_space<vmem>>, vector<1x30x30xf32>
    %1 = vector.shape_cast %0 : vector<1x30x30xf32> to vector<30x30xf32>
    %2 = vector.extract_strided_slice %1 {offsets = [0, 0], sizes = [28, 30], strides = [1, 1]} : vector<30x30xf32> to vector<28x30xf32>
    %c0_2 = arith.constant 0 : index
    %c0_3 = arith.constant 0 : index
    %c0_4 = arith.constant 0 : index
    %3 = vector.load %arg2[%c0_2, %c0_3, %c0_4] : memref<3x30x224xf32, #tpu.memory_space<vmem>>, vector<1x30x224xf32>
    %4 = vector.shape_cast %3 : vector<1x30x224xf32> to vector<30x224xf32>
    %cst = arith.constant dense<0.000000e+00> : vector<28x224xf32>
    %5 = tpu.matmul %2, %4, %cst {dimension_numbers = #tpu.dot_dimension_numbers<[1], [0], [0], [1], [0, 0, 1, 1], [], []>} : vector<28x30xf32>, vector<30x224xf32>, vector<28x224xf32> -> vector<28x224xf32>
    %6 = vector.extract_strided_slice %1 {offsets = [1, 0], sizes = [28, 30], strides = [1, 1]} : vector<30x30xf32> to vector<28x30xf32>
    %c1 = arith.constant 1 : index
    %c0_5 = arith.constant 0 : index
    %c0_6 = arith.constant 0 : index
    %7 = vector.load %arg2[%c1, %c0_5, %c0_6] : memref<3x30x224xf32, #tpu.memory_space<vmem>>, vector<1x30x224xf32>
    %8 = vector.shape_cast %7 : vector<1x30x224xf32> to vector<30x224xf32>
    %cst_7 = arith.constant dense<0.000000e+00> : vector<28x224xf32>
    %9 = tpu.matmul %6, %8, %cst_7 {dimension_numbers = #tpu.dot_dimension_numbers<[1], [0], [0], [1], [0, 0, 1, 1], [], []>} : vector<28x30xf32>, vector<30x224xf32>, vector<28x224xf32> -> vector<28x224xf32>
    %10 = arith.addf %5, %9 : vector<28x224xf32>
    %11 = vector.extract_strided_slice %1 {offsets = [2, 0], sizes = [28, 30], strides = [1, 1]} : vector<30x30xf32> to vector<28x30xf32>
    %c2 = arith.constant 2 : index
    %c0_8 = arith.constant 0 : index
    %c0_9 = arith.constant 0 : index
    %12 = vector.load %arg2[%c2, %c0_8, %c0_9] : memref<3x30x224xf32, #tpu.memory_space<vmem>>, vector<1x30x224xf32>
    %13 = vector.shape_cast %12 : vector<1x30x224xf32> to vector<30x224xf32>
    %cst_10 = arith.constant dense<0.000000e+00> : vector<28x224xf32>
    %14 = tpu.matmul %11, %13, %cst_10 {dimension_numbers = #tpu.dot_dimension_numbers<[1], [0], [0], [1], [0, 0, 1, 1], [], []>} : vector<28x30xf32>, vector<30x224xf32>, vector<28x224xf32> -> vector<28x224xf32>
    %15 = arith.addf %10, %14 : vector<28x224xf32>
    %c0_11 = arith.constant 0 : index
    %c0_12 = arith.constant 0 : index
    %16 = vector.load %arg3[%c0_11, %c0_12] : memref<2x224xf32, #tpu.memory_space<vmem>>, vector<1x224xf32>
    %17 = vector.broadcast %16 : vector<1x224xf32> to vector<28x224xf32>
    %18 = arith.mulf %15, %17 : vector<28x224xf32>
    %c1_13 = arith.constant 1 : index
    %c0_14 = arith.constant 0 : index
    %19 = vector.load %arg3[%c1_13, %c0_14] : memref<2x224xf32, #tpu.memory_space<vmem>>, vector<1x224xf32>
    %20 = vector.broadcast %19 : vector<1x224xf32> to vector<28x224xf32>
    %21 = arith.addf %18, %20 : vector<28x224xf32>
    %cst_15 = arith.constant 0.000000e+00 : f32
    %22 = vector.broadcast %cst_15 : f32 to vector<28x224xf32>
    %23 = arith.maximumf %21, %22 : vector<28x224xf32>
    %c0_16 = arith.constant 0 : index
    %c0_17 = arith.constant 0 : index
    %c0_18 = arith.constant 0 : index
    %24 = vector.load %arg4[%c0_16, %c0_17, %c0_18] : memref<2x16x28xf32, #tpu.memory_space<vmem>>, vector<1x16x28xf32>
    %25 = vector.shape_cast %24 : vector<1x16x28xf32> to vector<16x28xf32>
    %cst_19 = arith.constant dense<0.000000e+00> : vector<16x224xf32>
    %26 = tpu.matmul %25, %23, %cst_19 {dimension_numbers = #tpu.dot_dimension_numbers<[1], [0], [0], [1], [0, 0, 1, 1], [], []>} : vector<16x28xf32>, vector<28x224xf32>, vector<16x224xf32> -> vector<16x224xf32>
    %c1_20 = arith.constant 1 : index
    %c0_21 = arith.constant 0 : index
    %c0_22 = arith.constant 0 : index
    %27 = vector.load %arg4[%c1_20, %c0_21, %c0_22] : memref<2x16x28xf32, #tpu.memory_space<vmem>>, vector<1x16x28xf32>
    %28 = vector.shape_cast %27 : vector<1x16x28xf32> to vector<16x28xf32>
    %cst_23 = arith.constant dense<0.000000e+00> : vector<16x224xf32>
    %29 = tpu.matmul %28, %23, %cst_23 {dimension_numbers = #tpu.dot_dimension_numbers<[1], [0], [0], [1], [0, 0, 1, 1], [], []>} : vector<16x28xf32>, vector<28x224xf32>, vector<16x224xf32> -> vector<16x224xf32>
    %30 = arith.maximumf %26, %29 : vector<16x224xf32>
    %c0_24 = arith.constant 0 : index
    %c0_25 = arith.constant 0 : index
    %c0_26 = arith.constant 0 : index
    %31 = vector.load %arg5[%c0_24, %c0_25, %c0_26] : memref<2x224x128xf32, #tpu.memory_space<vmem>>, vector<1x224x128xf32>
    %32 = vector.shape_cast %31 : vector<1x224x128xf32> to vector<224x128xf32>
    %cst_27 = arith.constant dense<0.000000e+00> : vector<16x128xf32>
    %33 = tpu.matmul %30, %32, %cst_27 {dimension_numbers = #tpu.dot_dimension_numbers<[1], [0], [0], [1], [0, 0, 1, 1], [], []>} : vector<16x224xf32>, vector<224x128xf32>, vector<16x128xf32> -> vector<16x128xf32>
    %c1_28 = arith.constant 1 : index
    %c0_29 = arith.constant 0 : index
    %c0_30 = arith.constant 0 : index
    %34 = vector.load %arg5[%c1_28, %c0_29, %c0_30] : memref<2x224x128xf32, #tpu.memory_space<vmem>>, vector<1x224x128xf32>
    %35 = vector.shape_cast %34 : vector<1x224x128xf32> to vector<224x128xf32>
    %cst_31 = arith.constant dense<0.000000e+00> : vector<16x128xf32>
    %36 = tpu.matmul %30, %35, %cst_31 {dimension_numbers = #tpu.dot_dimension_numbers<[1], [0], [0], [1], [0, 0, 1, 1], [], []>} : vector<16x224xf32>, vector<224x128xf32>, vector<16x128xf32> -> vector<16x128xf32>
    %37 = arith.maximumf %33, %36 : vector<16x128xf32>
    %38 = vector.extract_strided_slice %37 {offsets = [0, 0], sizes = [14, 128], strides = [1, 1]} : vector<16x128xf32> to vector<14x128xf32>
    %c0_32 = arith.constant 0 : index
    %c0_33 = arith.constant 0 : index
    %c0_34 = arith.constant 0 : index
    %39 = vector.load %arg6[%c0_32, %c0_33, %c0_34] : memref<3x128x224xf32, #tpu.memory_space<vmem>>, vector<1x128x224xf32>
    %40 = vector.shape_cast %39 : vector<1x128x224xf32> to vector<128x224xf32>
    %cst_35 = arith.constant dense<0.000000e+00> : vector<14x224xf32>
    %41 = tpu.matmul %38, %40, %cst_35 {dimension_numbers = #tpu.dot_dimension_numbers<[1], [0], [0], [1], [0, 0, 1, 1], [], []>} : vector<14x128xf32>, vector<128x224xf32>, vector<14x224xf32> -> vector<14x224xf32>
    %42 = vector.extract_strided_slice %37 {offsets = [1, 0], sizes = [14, 128], strides = [1, 1]} : vector<16x128xf32> to vector<14x128xf32>
    %c1_36 = arith.constant 1 : index
    %c0_37 = arith.constant 0 : index
    %c0_38 = arith.constant 0 : index
    %43 = vector.load %arg6[%c1_36, %c0_37, %c0_38] : memref<3x128x224xf32, #tpu.memory_space<vmem>>, vector<1x128x224xf32>
    %44 = vector.shape_cast %43 : vector<1x128x224xf32> to vector<128x224xf32>
    %cst_39 = arith.constant dense<0.000000e+00> : vector<14x224xf32>
    %45 = tpu.matmul %42, %44, %cst_39 {dimension_numbers = #tpu.dot_dimension_numbers<[1], [0], [0], [1], [0, 0, 1, 1], [], []>} : vector<14x128xf32>, vector<128x224xf32>, vector<14x224xf32> -> vector<14x224xf32>
    %46 = arith.addf %41, %45 : vector<14x224xf32>
    %47 = vector.extract_strided_slice %37 {offsets = [2, 0], sizes = [14, 128], strides = [1, 1]} : vector<16x128xf32> to vector<14x128xf32>
    %c2_40 = arith.constant 2 : index
    %c0_41 = arith.constant 0 : index
    %c0_42 = arith.constant 0 : index
    %48 = vector.load %arg6[%c2_40, %c0_41, %c0_42] : memref<3x128x224xf32, #tpu.memory_space<vmem>>, vector<1x128x224xf32>
    %49 = vector.shape_cast %48 : vector<1x128x224xf32> to vector<128x224xf32>
    %cst_43 = arith.constant dense<0.000000e+00> : vector<14x224xf32>
    %50 = tpu.matmul %47, %49, %cst_43 {dimension_numbers = #tpu.dot_dimension_numbers<[1], [0], [0], [1], [0, 0, 1, 1], [], []>} : vector<14x128xf32>, vector<128x224xf32>, vector<14x224xf32> -> vector<14x224xf32>
    %51 = arith.addf %46, %50 : vector<14x224xf32>
    %c0_44 = arith.constant 0 : index
    %c0_45 = arith.constant 0 : index
    %52 = vector.load %arg7[%c0_44, %c0_45] : memref<2x224xf32, #tpu.memory_space<vmem>>, vector<1x224xf32>
    %53 = vector.broadcast %52 : vector<1x224xf32> to vector<14x224xf32>
    %54 = arith.mulf %51, %53 : vector<14x224xf32>
    %c1_46 = arith.constant 1 : index
    %c0_47 = arith.constant 0 : index
    %55 = vector.load %arg7[%c1_46, %c0_47] : memref<2x224xf32, #tpu.memory_space<vmem>>, vector<1x224xf32>
    %56 = vector.broadcast %55 : vector<1x224xf32> to vector<14x224xf32>
    %57 = arith.addf %54, %56 : vector<14x224xf32>
    %cst_48 = arith.constant 0.000000e+00 : f32
    %58 = vector.broadcast %cst_48 : f32 to vector<14x224xf32>
    %59 = arith.maximumf %57, %58 : vector<14x224xf32>
    %c0_49 = arith.constant 0 : index
    %c0_50 = arith.constant 0 : index
    %c0_51 = arith.constant 0 : index
    %60 = vector.load %arg8[%c0_49, %c0_50, %c0_51] : memref<2x7x14xf32, #tpu.memory_space<vmem>>, vector<1x7x14xf32>
    %61 = vector.shape_cast %60 : vector<1x7x14xf32> to vector<7x14xf32>
    %cst_52 = arith.constant dense<0.000000e+00> : vector<7x224xf32>
    %62 = tpu.matmul %61, %59, %cst_52 {dimension_numbers = #tpu.dot_dimension_numbers<[1], [0], [0], [1], [0, 0, 1, 1], [], []>} : vector<7x14xf32>, vector<14x224xf32>, vector<7x224xf32> -> vector<7x224xf32>
    %c1_53 = arith.constant 1 : index
    %c0_54 = arith.constant 0 : index
    %c0_55 = arith.constant 0 : index
    %63 = vector.load %arg8[%c1_53, %c0_54, %c0_55] : memref<2x7x14xf32, #tpu.memory_space<vmem>>, vector<1x7x14xf32>
    %64 = vector.shape_cast %63 : vector<1x7x14xf32> to vector<7x14xf32>
    %cst_56 = arith.constant dense<0.000000e+00> : vector<7x224xf32>
    %65 = tpu.matmul %64, %59, %cst_56 {dimension_numbers = #tpu.dot_dimension_numbers<[1], [0], [0], [1], [0, 0, 1, 1], [], []>} : vector<7x14xf32>, vector<14x224xf32>, vector<7x224xf32> -> vector<7x224xf32>
    %66 = arith.maximumf %62, %65 : vector<7x224xf32>
    %c0_57 = arith.constant 0 : index
    %c0_58 = arith.constant 0 : index
    %c0_59 = arith.constant 0 : index
    %67 = vector.load %arg9[%c0_57, %c0_58, %c0_59] : memref<2x224x112xf32, #tpu.memory_space<vmem>>, vector<1x224x112xf32>
    %68 = vector.shape_cast %67 : vector<1x224x112xf32> to vector<224x112xf32>
    %cst_60 = arith.constant dense<0.000000e+00> : vector<7x112xf32>
    %69 = tpu.matmul %66, %68, %cst_60 {dimension_numbers = #tpu.dot_dimension_numbers<[1], [0], [0], [1], [0, 0, 1, 1], [], []>} : vector<7x224xf32>, vector<224x112xf32>, vector<7x112xf32> -> vector<7x112xf32>
    %c1_61 = arith.constant 1 : index
    %c0_62 = arith.constant 0 : index
    %c0_63 = arith.constant 0 : index
    %70 = vector.load %arg9[%c1_61, %c0_62, %c0_63] : memref<2x224x112xf32, #tpu.memory_space<vmem>>, vector<1x224x112xf32>
    %71 = vector.shape_cast %70 : vector<1x224x112xf32> to vector<224x112xf32>
    %cst_64 = arith.constant dense<0.000000e+00> : vector<7x112xf32>
    %72 = tpu.matmul %66, %71, %cst_64 {dimension_numbers = #tpu.dot_dimension_numbers<[1], [0], [0], [1], [0, 0, 1, 1], [], []>} : vector<7x224xf32>, vector<224x112xf32>, vector<7x112xf32> -> vector<7x112xf32>
    %73 = arith.maximumf %69, %72 : vector<7x112xf32>
    %74 = vector.extract_strided_slice %73 {offsets = [0, 0], sizes = [1, 112], strides = [1, 1]} : vector<7x112xf32> to vector<1x112xf32>
    %c0_65 = arith.constant 0 : index
    %c0_66 = arith.constant 0 : index
    %c0_67 = arith.constant 0 : index
    %75 = vector.load %arg10[%c0_65, %c0_66, %c0_67] : memref<7x112x32xf32, #tpu.memory_space<vmem>>, vector<1x112x32xf32>
    %76 = vector.shape_cast %75 : vector<1x112x32xf32> to vector<112x32xf32>
    %cst_68 = arith.constant dense<0.000000e+00> : vector<1x32xf32>
    %77 = tpu.matmul %74, %76, %cst_68 {dimension_numbers = #tpu.dot_dimension_numbers<[1], [0], [0], [1], [0, 0, 1, 1], [], []>} : vector<1x112xf32>, vector<112x32xf32>, vector<1x32xf32> -> vector<1x32xf32>
    %78 = vector.extract_strided_slice %73 {offsets = [1, 0], sizes = [1, 112], strides = [1, 1]} : vector<7x112xf32> to vector<1x112xf32>
    %c1_69 = arith.constant 1 : index
    %c0_70 = arith.constant 0 : index
    %c0_71 = arith.constant 0 : index
    %79 = vector.load %arg10[%c1_69, %c0_70, %c0_71] : memref<7x112x32xf32, #tpu.memory_space<vmem>>, vector<1x112x32xf32>
    %80 = vector.shape_cast %79 : vector<1x112x32xf32> to vector<112x32xf32>
    %cst_72 = arith.constant dense<0.000000e+00> : vector<1x32xf32>
    %81 = tpu.matmul %78, %80, %cst_72 {dimension_numbers = #tpu.dot_dimension_numbers<[1], [0], [0], [1], [0, 0, 1, 1], [], []>} : vector<1x112xf32>, vector<112x32xf32>, vector<1x32xf32> -> vector<1x32xf32>
    %82 = arith.addf %77, %81 : vector<1x32xf32>
    %83 = vector.extract_strided_slice %73 {offsets = [2, 0], sizes = [1, 112], strides = [1, 1]} : vector<7x112xf32> to vector<1x112xf32>
    %c2_73 = arith.constant 2 : index
    %c0_74 = arith.constant 0 : index
    %c0_75 = arith.constant 0 : index
    %84 = vector.load %arg10[%c2_73, %c0_74, %c0_75] : memref<7x112x32xf32, #tpu.memory_space<vmem>>, vector<1x112x32xf32>
    %85 = vector.shape_cast %84 : vector<1x112x32xf32> to vector<112x32xf32>
    %cst_76 = arith.constant dense<0.000000e+00> : vector<1x32xf32>
    %86 = tpu.matmul %83, %85, %cst_76 {dimension_numbers = #tpu.dot_dimension_numbers<[1], [0], [0], [1], [0, 0, 1, 1], [], []>} : vector<1x112xf32>, vector<112x32xf32>, vector<1x32xf32> -> vector<1x32xf32>
    %87 = arith.addf %82, %86 : vector<1x32xf32>
    %88 = vector.extract_strided_slice %73 {offsets = [3, 0], sizes = [1, 112], strides = [1, 1]} : vector<7x112xf32> to vector<1x112xf32>
    %c3 = arith.constant 3 : index
    %c0_77 = arith.constant 0 : index
    %c0_78 = arith.constant 0 : index
    %89 = vector.load %arg10[%c3, %c0_77, %c0_78] : memref<7x112x32xf32, #tpu.memory_space<vmem>>, vector<1x112x32xf32>
    %90 = vector.shape_cast %89 : vector<1x112x32xf32> to vector<112x32xf32>
    %cst_79 = arith.constant dense<0.000000e+00> : vector<1x32xf32>
    %91 = tpu.matmul %88, %90, %cst_79 {dimension_numbers = #tpu.dot_dimension_numbers<[1], [0], [0], [1], [0, 0, 1, 1], [], []>} : vector<1x112xf32>, vector<112x32xf32>, vector<1x32xf32> -> vector<1x32xf32>
    %92 = arith.addf %87, %91 : vector<1x32xf32>
    %93 = vector.extract_strided_slice %73 {offsets = [4, 0], sizes = [1, 112], strides = [1, 1]} : vector<7x112xf32> to vector<1x112xf32>
    %c4 = arith.constant 4 : index
    %c0_80 = arith.constant 0 : index
    %c0_81 = arith.constant 0 : index
    %94 = vector.load %arg10[%c4, %c0_80, %c0_81] : memref<7x112x32xf32, #tpu.memory_space<vmem>>, vector<1x112x32xf32>
    %95 = vector.shape_cast %94 : vector<1x112x32xf32> to vector<112x32xf32>
    %cst_82 = arith.constant dense<0.000000e+00> : vector<1x32xf32>
    %96 = tpu.matmul %93, %95, %cst_82 {dimension_numbers = #tpu.dot_dimension_numbers<[1], [0], [0], [1], [0, 0, 1, 1], [], []>} : vector<1x112xf32>, vector<112x32xf32>, vector<1x32xf32> -> vector<1x32xf32>
    %97 = arith.addf %92, %96 : vector<1x32xf32>
    %98 = vector.extract_strided_slice %73 {offsets = [5, 0], sizes = [1, 112], strides = [1, 1]} : vector<7x112xf32> to vector<1x112xf32>
    %c5 = arith.constant 5 : index
    %c0_83 = arith.constant 0 : index
    %c0_84 = arith.constant 0 : index
    %99 = vector.load %arg10[%c5, %c0_83, %c0_84] : memref<7x112x32xf32, #tpu.memory_space<vmem>>, vector<1x112x32xf32>
    %100 = vector.shape_cast %99 : vector<1x112x32xf32> to vector<112x32xf32>
    %cst_85 = arith.constant dense<0.000000e+00> : vector<1x32xf32>
    %101 = tpu.matmul %98, %100, %cst_85 {dimension_numbers = #tpu.dot_dimension_numbers<[1], [0], [0], [1], [0, 0, 1, 1], [], []>} : vector<1x112xf32>, vector<112x32xf32>, vector<1x32xf32> -> vector<1x32xf32>
    %102 = arith.addf %97, %101 : vector<1x32xf32>
    %103 = vector.extract_strided_slice %73 {offsets = [6, 0], sizes = [1, 112], strides = [1, 1]} : vector<7x112xf32> to vector<1x112xf32>
    %c6 = arith.constant 6 : index
    %c0_86 = arith.constant 0 : index
    %c0_87 = arith.constant 0 : index
    %104 = vector.load %arg10[%c6, %c0_86, %c0_87] : memref<7x112x32xf32, #tpu.memory_space<vmem>>, vector<1x112x32xf32>
    %105 = vector.shape_cast %104 : vector<1x112x32xf32> to vector<112x32xf32>
    %cst_88 = arith.constant dense<0.000000e+00> : vector<1x32xf32>
    %106 = tpu.matmul %103, %105, %cst_88 {dimension_numbers = #tpu.dot_dimension_numbers<[1], [0], [0], [1], [0, 0, 1, 1], [], []>} : vector<1x112xf32>, vector<112x32xf32>, vector<1x32xf32> -> vector<1x32xf32>
    %107 = arith.addf %102, %106 : vector<1x32xf32>
    %c0_89 = arith.constant 0 : index
    %c0_90 = arith.constant 0 : index
    %108 = vector.load %arg11[%c0_89, %c0_90] : memref<2x32xf32, #tpu.memory_space<vmem>>, vector<1x32xf32>
    %109 = arith.mulf %107, %108 : vector<1x32xf32>
    %c1_91 = arith.constant 1 : index
    %c0_92 = arith.constant 0 : index
    %110 = vector.load %arg11[%c1_91, %c0_92] : memref<2x32xf32, #tpu.memory_space<vmem>>, vector<1x32xf32>
    %111 = arith.addf %109, %110 : vector<1x32xf32>
    %cst_93 = arith.constant 0.000000e+00 : f32
    %112 = vector.broadcast %cst_93 : f32 to vector<1x32xf32>
    %113 = arith.maximumf %111, %112 : vector<1x32xf32>
    %c0_94 = arith.constant 0 : index
    %c0_95 = arith.constant 0 : index
    %114 = vector.load %arg12[%c0_94, %c0_95] : memref<32x128xf32, #tpu.memory_space<vmem>>, vector<32x128xf32>
    %cst_96 = arith.constant dense<0.000000e+00> : vector<1x128xf32>
    %115 = tpu.matmul %113, %114, %cst_96 {dimension_numbers = #tpu.dot_dimension_numbers<[1], [0], [0], [1], [0, 0, 1, 1], [], []>} : vector<1x32xf32>, vector<32x128xf32>, vector<1x128xf32> -> vector<1x128xf32>
    %c0_97 = arith.constant 0 : index
    %c0_98 = arith.constant 0 : index
    %116 = vector.load %arg13[%c0_97, %c0_98] : memref<1x128xf32, #tpu.memory_space<vmem>>, vector<1x128xf32>
    %117 = arith.addf %115, %116 : vector<1x128xf32>
    %c0_99 = arith.constant 0 : index
    %c0_100 = arith.constant 0 : index
    %c0_101 = arith.constant 0 : index
    %118 = vector.load %arg14[%c0_99, %c0_100, %c0_101] : memref<1x1x128xf32, #tpu.memory_space<vmem>>, vector<1x1x128xf32>
    %119 = vector.shape_cast %118 : vector<1x1x128xf32> to vector<1x128xf32>
    %120 = vector.shape_cast %117 : vector<1x128xf32> to vector<1x1x128xf32>
    tpu.vector_store %arg14[%c0_99, %c0_100, %c0_101], %120 {strides = array<i32>} : memref<1x1x128xf32, #tpu.memory_space<vmem>>, vector<1x1x128xf32>,
    return
  }
  func.func @transform_0(%arg0: i32) -> (i32, i32, i32) {
    %c0_i32 = arith.constant 0 : i32
    %c0_i32_0 = arith.constant 0 : i32
    %c0_i32_1 = arith.constant 0 : i32
    return %arg0, %c0_i32, %c0_i32_0 : i32, i32, i32
  }
  func.func @transform_1(%arg0: i32) -> (i32, i32, i32) {
    %c0_i32 = arith.constant 0 : i32
    %c0_i32_0 = arith.constant 0 : i32
    %c0_i32_1 = arith.constant 0 : i32
    %c0_i32_2 = arith.constant 0 : i32
    return %c0_i32, %c0_i32_0, %c0_i32_1 : i32, i32, i32
  }
  func.func @transform_2(%arg0: i32) -> (i32, i32) {
    %c0_i32 = arith.constant 0 : i32
    %c0_i32_0 = arith.constant 0 : i32
    %c0_i32_1 = arith.constant 0 : i32
    return %c0_i32, %c0_i32_0 : i32, i32
  }
  func.func @transform_3(%arg0: i32) -> (i32, i32, i32) {
    %c0_i32 = arith.constant 0 : i32
    %c0_i32_0 = arith.constant 0 : i32
    %c0_i32_1 = arith.constant 0 : i32
    %c0_i32_2 = arith.constant 0 : i32
    return %c0_i32, %c0_i32_0, %c0_i32_1 : i32, i32, i32
  }
  func.func @transform_4(%arg0: i32) -> (i32, i32, i32) {
    %c0_i32 = arith.constant 0 : i32
    %c0_i32_0 = arith.constant 0 : i32
    %c0_i32_1 = arith.constant 0 : i32
    %c0_i32_2 = arith.constant 0 : i32
    return %c0_i32, %c0_i32_0, %c0_i32_1 : i32, i32, i32
  }
  func.func @transform_5(%arg0: i32) -> (i32, i32, i32) {
    %c0_i32 = arith.constant 0 : i32
    %c0_i32_0 = arith.constant 0 : i32
    %c0_i32_1 = arith.constant 0 : i32
    %c0_i32_2 = arith.constant 0 : i32
    return %c0_i32, %c0_i32_0, %c0_i32_1 : i32, i32, i32
  }
  func.func @transform_6(%arg0: i32) -> (i32, i32) {
    %c0_i32 = arith.constant 0 : i32
    %c0_i32_0 = arith.constant 0 : i32
    %c0_i32_1 = arith.constant 0 : i32
    return %c0_i32, %c0_i32_0 : i32, i32
  }
  func.func @transform_7(%arg0: i32) -> (i32, i32, i32) {
    %c0_i32 = arith.constant 0 : i32
    %c0_i32_0 = arith.constant 0 : i32
    %c0_i32_1 = arith.constant 0 : i32
    %c0_i32_2 = arith.constant 0 : i32
    return %c0_i32, %c0_i32_0, %c0_i32_1 : i32, i32, i32
  }
  func.func @transform_8(%arg0: i32) -> (i32, i32, i32) {
    %c0_i32 = arith.constant 0 : i32
    %c0_i32_0 = arith.constant 0 : i32
    %c0_i32_1 = arith.constant 0 : i32
    %c0_i32_2 = arith.constant 0 : i32
    return %c0_i32, %c0_i32_0, %c0_i32_1 : i32, i32, i32
  }
  func.func @transform_9(%arg0: i32) -> (i32, i32, i32) {
    %c0_i32 = arith.constant 0 : i32
    %c0_i32_0 = arith.constant 0 : i32
    %c0_i32_1 = arith.constant 0 : i32
    %c0_i32_2 = arith.constant 0 : i32
    return %c0_i32, %c0_i32_0, %c0_i32_1 : i32, i32, i32
  }
  func.func @transform_10(%arg0: i32) -> (i32, i32) {
    %c0_i32 = arith.constant 0 : i32
    %c0_i32_0 = arith.constant 0 : i32
    %c0_i32_1 = arith.constant 0 : i32
    return %c0_i32, %c0_i32_0 : i32, i32
  }
  func.func @transform_11(%arg0: i32) -> (i32, i32) {
    %c0_i32 = arith.constant 0 : i32
    %c0_i32_0 = arith.constant 0 : i32
    %c0_i32_1 = arith.constant 0 : i32
    return %c0_i32, %c0_i32_0 : i32, i32
  }
  func.func @transform_12(%arg0: i32) -> (i32, i32) {
    %c0_i32 = arith.constant 0 : i32
    %c0_i32_0 = arith.constant 0 : i32
    %c0_i32_1 = arith.constant 0 : i32
    return %c0_i32, %c0_i32_0 : i32, i32
  }
  func.func @transform_13(%arg0: i32) -> (i32, i32, i32) {
    %c0_i32 = arith.constant 0 : i32
    %c0_i32_0 = arith.constant 0 : i32
    %c0_i32_1 = arith.constant 0 : i32
    return %arg0, %c0_i32, %c0_i32_0 : i32, i32, i32
  }
}

</mosaic_0001>

<bundles_post_ra>
// kernel: tile.27
= control target key start
LH: loop header
LB: loop body
LE: loop exit
PB: predicated region body
PF: predicated region fallthrough
CT: control target
= control target key end

     0   :  { %s40_s0 = inlined_call_operand.vmem [shape: f32[8], index: 0, kind: input, shape index: {}]   ;;  %s41_s1 = inlined_call_operand.vmem [shape: f32[28,8], index: 1, kind: output, shape index: {}]  }
   0x1   :  { %v4_v0 = vld [vmem:[%s40_s0] ss:$0 sm:$0xff] }
   0x2   :  { %5 = vst [vmem:[%s41_s1] sm:$0xff] %v4_v0 }
   0x3   :  { %12 = vst [vmem:[%s41_s1 + $0x8] sm:$0xff] %v4_v0 }
   0x4   :  { %13 = vst [vmem:[%s41_s1 + $0x10] sm:$0xff] %v4_v0 }
   0x5   :  { %14 = vst [vmem:[%s41_s1 + $0x18] sm:$0xff] %v4_v0 }

// kernel: tile.29
= control target key start
LH: loop header
LB: loop body
LE: loop exit
PB: predicated region body
PF: predicated region fallthrough
CT: control target
= control target key end

     0   :  { %s150_s10 = smov 120   ;;  %s151_s11 = smov 104   ;;  %vm4_vm0 = vcmask 64512   ;;  %vm10_vm1 = vcmask 1048512   ;;  %vm16_vm2 = vcmask 982912   ;;  %vm22_vm3 = vcmask 917312   ;;  %s229_s0 = inlined_call_operand.vmem [shape: f32[28,8], index: 0, kind: input, shape index: {}]   ;;  %s230_s1 = inlined_call_operand.vmem [shape: f32[1,224], index: 1, kind: output, shape index: {}]  }
   0x1   :  { %v119_v0 = vld [vmem:[%s229_s0 + $0xf] sm:$0x1]   ;;  %v121_v1 = vld [vmem:[%s229_s0 + $0xd] sm:$0x1]   ;;  %v120_v2 = vld [vmem:[%s229_s0 + $0xe] sm:$0x1]  }
   0x2   :  { %8 = vrot.lane.b32.xlu0 %v119_v0, %s150_s10  ;;  %20 = vrot.lane.b32.xlu1 %v121_v1, %s151_s11  ;;  %v122_v3 = vld [vmem:[%s229_s0 + $0xc] sm:$0x1]   ;;  %s31_s16 = smov 3  ;;  %s152_s19 = smov 88   ;;  %vm28_vm4 = vcmask 851712   ;;  %vm35_vm5 = vcmask 786112  }
   0x3   :  { %v123_v4 = vld [vmem:[%s229_s0 + $0xb] ss:$16 sm:%s31_s16]   ;;  %s153_s20 = smov 112   ;;  %s154_s21 = smov 96   ;;  %vm42_vm6 = vcmask 720512   ;;  %vm49_vm7 = vcmask 654912  }
   0x4   :  { %33 = vrot.lane.b32.xlu2 %v123_v4, %s152_s19  ;;  %s38_s22 = smov 3  ;;  %s45_s23 = smov 3  ;;  %vm56_vm8 = vcmask 589312   ;;  %vm63_vm9 = vcmask 523712   ;;  %vm70_vm10 = vcmask 458112   ;;  %vm77_vm11 = vcmask 392512  }
   0x5   :  { %s52_s24 = smov 3  ;;  %v124_v5 = vld [vmem:[%s229_s0 + $0xa] ss:$16 sm:%s38_s22]   ;;  %v125_v6 = vld [vmem:[%s229_s0 + $0x9] ss:$16 sm:%s45_s23]   ;;  %s155_s2 = smov 80  }
   0x6   :  { %v126_v7 = vld [vmem:[%s229_s0 + $0x8] ss:$16 sm:%s52_s24]   ;;  %s156_s3 = smov 72   ;;  %s157_s4 = smov 64   ;;  %vm84_vm12 = vcmask 326912   ;;  %vm91_vm13 = vcmask 261312  }
   0x7   :  { %s59_s5 = smov 3  ;;  %s66_s6 = smov 3  ;;  %vm98_vm14 = vcmask 195712   ;;  %vm105_vm15 = vcmask 130112  }
   0x8   :  { %s73_s7 = smov 3  ;;  %v127_v8 = vld [vmem:[%s229_s0 + $0x7] ss:$16 sm:%s59_s5]   ;;  %v128_v9 = vld [vmem:[%s229_s0 + $0x6] ss:$16 sm:%s66_s6]   ;;  %s158_s14 = smov 56  }
   0x9   :  { %v129_v10 = vld [vmem:[%s229_s0 + $0x5] ss:$16 sm:%s73_s7]   ;;  %s159_s15 = smov 48   ;;  %s160_s16 = smov 40  }
   0xa   :  { %14 = vrot.lane.b32.xlu0 %v120_v2, %s153_s20  ;;  %26 = vrot.lane.b32.xlu1 %v122_v3, %s154_s21  ;;  %s80_s17 = smov 3  ;;  %s87_s18 = smov 3 }
   0xb   :  { %s94_s19 = smov 3  ;;  %v130_v11 = vld [vmem:[%s229_s0 + $0x4] ss:$16 sm:%s80_s17]   ;;  %v131_v12 = vld [vmem:[%s229_s0 + $0x3] ss:$16 sm:%s87_s18]   ;;  %s161_s26 = smov 32  }
   0xc   :  { %40 = vrot.lane.b32.xlu2 %v124_v5, %s155_s2  ;;  %v132_v13 = vld [vmem:[%s229_s0 + $0x2] ss:$16 sm:%s94_s19]   ;;  %s162_s27 = smov 24   ;;  %s163_s28 = smov 16  }
   0xd   :  { %s101_s29 = smov 3 }
   0xe   :  { %v133_v14 = vld [vmem:[%s229_s0 + $0x1] ss:$16 sm:%s101_s29]  }
  0x12   :  { %47 = vrot.lane.b32.xlu0 %v125_v6, %s156_s3  ;;  %54 = vrot.lane.b32.xlu1 %v126_v7, %s157_s4  ;;  %s164_s3 = smov 8   ;;  %s2_s4 = smov 3 }
  0x13   :  { %v3_v15 = vld [vmem:[%s229_s0] ss:$16 sm:%s2_s4]  }
  0x14   :  { %61 = vrot.lane.b32.xlu2 %v127_v8, %s158_s14  ;;  %5 = vst.msk [vmem:[#allocation0] ss:$8 sm:$0x3] %vm4_vm0, %v3_v15  }
  0x1a   :  { %68 = vrot.lane.b32.xlu0 %v128_v9, %s159_s15  ;;  %75 = vrot.lane.b32.xlu1 %v129_v10, %s160_s16 }
  0x1c   :  { %82 = vrot.lane.b32.xlu2 %v130_v11, %s161_s26 }
  0x22   :  { %89 = vrot.lane.b32.xlu0 %v131_v12, %s162_s27  ;;  %96 = vrot.lane.b32.xlu1 %v132_v13, %s163_s28 }
  0x24   :  { %103 = vrot.lane.b32.xlu2 %v133_v14, %s164_s3 }
  0x5e   :  { %v34_v16 = vpop.permute.xlu2 %33  }
  0x66   :  { %v41_v17 = vpop.permute.xlu2 %40  }
  0x6e   :  { %v62_v18 = vpop.permute.xlu2 %61  }
  0x74   :  { %v9_v19 = vpop.permute.xlu0 %8   ;;  %v21_v20 = vpop.permute.xlu1 %20  }
  0x75   :  { %11 = vst.msk [vmem:[#allocation0] sm:$0x1] %vm10_vm1, %v9_v19  }
  0x76   :  { %v83_v21 = vpop.permute.xlu2 %82  }
  0x7c   :  { %v15_v22 = vpop.permute.xlu0 %14   ;;  %v27_v23 = vpop.permute.xlu1 %26  }
  0x7d   :  { %17 = vst.msk [vmem:[#allocation0] sm:$0x1] %vm16_vm2, %v15_v22  }
  0x7e   :  { %23 = vst.msk [vmem:[#allocation0] sm:$0x1] %vm22_vm3, %v21_v20   ;;  %v104_v24 = vpop.permute.xlu2 %103  }
  0x7f   :  { %29 = vst.msk [vmem:[#allocation0] sm:$0x1] %vm28_vm4, %v27_v23  }
  0x80   :  { %36 = vst.msk [vmem:[#allocation0] ss:$8 sm:$0x3] %vm35_vm5, %v34_v16  }
  0x81   :  { %43 = vst.msk [vmem:[#allocation0] ss:$8 sm:$0x3] %vm42_vm6, %v41_v17  }
  0x84   :  { %v48_v25 = vpop.permute.xlu0 %47   ;;  %v55_v26 = vpop.permute.xlu1 %54  }
  0x85   :  { %50 = vst.msk [vmem:[#allocation0] ss:$8 sm:$0x3] %vm49_vm7, %v48_v25  }
  0x86   :  { %57 = vst.msk [vmem:[#allocation0] ss:$8 sm:$0x3] %vm56_vm8, %v55_v26  }
  0x87   :  { %64 = vst.msk [vmem:[#allocation0] ss:$8 sm:$0x3] %vm63_vm9, %v62_v18  }
  0x8c   :  { %v69_v27 = vpop.permute.xlu0 %68   ;;  %v76_v28 = vpop.permute.xlu1 %75  }
  0x8d   :  { %71 = vst.msk [vmem:[#allocation0] ss:$8 sm:$0x3] %vm70_vm10, %v69_v27  }
  0x8e   :  { %78 = vst.msk [vmem:[#allocation0] ss:$8 sm:$0x3] %vm77_vm11, %v76_v28  }
  0x8f   :  { %85 = vst.msk [vmem:[#allocation0] ss:$8 sm:$0x3] %vm84_vm12, %v83_v21  }
  0x94   :  { %v90_v29 = vpop.permute.xlu0 %89   ;;  %v97_v30 = vpop.permute.xlu1 %96  }
  0x95   :  { %92 = vst.msk [vmem:[#allocation0] ss:$8 sm:$0x3] %vm91_vm13, %v90_v29  }
  0x96   :  { %99 = vst.msk [vmem:[#allocation0] ss:$8 sm:$0x3] %vm98_vm14, %v97_v30  }
  0x97   :  { %106 = vst.msk [vmem:[#allocation0] ss:$8 sm:$0x3] %vm105_vm15, %v104_v24  }
  0x9e   :  { %v109_v31 = vld [vmem:[#allocation0] sm:$0x1]  ;;  %v114_v32 = vld [vmem:[#allocation0 + $0x8] sm:$0x1] }
  0x9f   :  { %112 = vst [vmem:[%s230_s1] sm:$0x1] %v109_v31 }
  0xa0   :  { %134 = vst [vmem:[%s230_s1 + $0x1] sm:$0x1] %v114_v32 }

// kernel: tile.37
= control target key start
LH: loop header
LB: loop body
LE: loop exit
PB: predicated region body
PF: predicated region fallthrough
CT: control target
= control target key end

     0   :  { %s28_s0 = inlined_call_operand.vmem [shape: f32[16], index: 0, kind: input, shape index: {}]   ;;  %s29_s1 = inlined_call_operand.vmem [shape: f32[14,16], index: 1, kind: output, shape index: {}]  }
   0x1   :  { %v4_v0 = vld [vmem:[%s28_s0] ss:$0 sm:$0xff] }
   0x2   :  { %5 = vst [vmem:[%s29_s1] sm:$0xff] %v4_v0 }
   0x3   :  { %8 = vst [vmem:[%s29_s1 + $0x8] sm:$0xff] %v4_v0 }

// kernel: tile.39
= control target key start
LH: loop header
LB: loop body
LE: loop exit
PB: predicated region body
PF: predicated region fallthrough
CT: control target
= control target key end

     0   :  { %s19_s8 = smov 3  ;;  %s80_s9 = smov 112   ;;  %vm4_vm0 = vcmask 130048   ;;  %vm10_vm1 = vcmask 1048448   ;;  %vm16_vm2 = vcmask 917248   ;;  %vm23_vm3 = vcmask 786048   ;;  %s127_s0 = inlined_call_operand.vmem [shape: f32[14,16], index: 0, kind: input, shape index: {}]   ;;  %s128_s1 = inlined_call_operand.vmem [shape: f32[1,224], index: 1, kind: output, shape index: {}]  }
   0x1   :  { %v65_v0 = vld [vmem:[%s127_s0 + $0x7] sm:$0x1]   ;;  %v67_v1 = vld [vmem:[%s127_s0 + $0x5] ss:$8 sm:%s19_s8]   ;;  %s81_s12 = smov 80   ;;  %s26_s13 = smov 3 }
   0x2   :  { %8 = vrot.lane.b32.xlu0 %v65_v0, %s80_s9  ;;  %21 = vrot.lane.b32.xlu1 %v67_v1, %s81_s12  ;;  %s33_s14 = smov 3  ;;  %v66_v3 = vld [vmem:[%s127_s0 + $0x6] sm:$0x1]   ;;  %s82_s19 = smov 48   ;;  %vm30_vm4 = vcmask 654848   ;;  %vm37_vm5 = vcmask 523648  }
   0x3   :  { %v69_v2 = vld [vmem:[%s127_s0 + $0x3] ss:$8 sm:%s33_s14]   ;;  %v68_v4 = vld [vmem:[%s127_s0 + $0x4] ss:$8 sm:%s26_s13]   ;;  %s40_s22 = smov 3  ;;  %s83_s23 = smov 96  }
   0x4   :  { %35 = vrot.lane.b32.xlu2 %v69_v2, %s82_s19  ;;  %s84_s24 = smov 64   ;;  %s47_s25 = smov 3  ;;  %v70_v5 = vld [vmem:[%s127_s0 + $0x2] ss:$8 sm:%s40_s22]   ;;  %vm44_vm6 = vcmask 392448   ;;  %vm51_vm7 = vcmask 261248  }
   0x5   :  { %v71_v6 = vld [vmem:[%s127_s0 + $0x1] ss:$8 sm:%s47_s25]   ;;  %s85_s30 = smov 32   ;;  %s86_s2 = smov 16  }
   0x6   :  { %s2_s3 = smov 3 }
   0x7   :  { %v3_v7 = vld [vmem:[%s127_s0] ss:$8 sm:%s2_s3]  }
   0x8   :  { %5 = vst.msk [vmem:[#allocation0] ss:$8 sm:$0x3] %vm4_vm0, %v3_v7  }
   0xa   :  { %14 = vrot.lane.b32.xlu0 %v66_v3, %s83_s23  ;;  %28 = vrot.lane.b32.xlu1 %v68_v4, %s84_s24 }
   0xc   :  { %42 = vrot.lane.b32.xlu2 %v70_v5, %s85_s30 }
  0x12   :  { %49 = vrot.lane.b32.xlu0 %v71_v6, %s86_s2 }
  0x5e   :  { %v36_v8 = vpop.permute.xlu2 %35  }
  0x66   :  { %v43_v9 = vpop.permute.xlu2 %42  }
  0x74   :  { %v9_v10 = vpop.permute.xlu0 %8   ;;  %v22_v11 = vpop.permute.xlu1 %21  }
  0x75   :  { %11 = vst.msk [vmem:[#allocation0] sm:$0x1] %vm10_vm1, %v9_v10  }
  0x7c   :  { %v15_v12 = vpop.permute.xlu0 %14   ;;  %v29_v13 = vpop.permute.xlu1 %28  }
  0x7d   :  { %17 = vst.msk [vmem:[#allocation0] sm:$0x1] %vm16_vm2, %v15_v12  }
  0x7e   :  { %24 = vst.msk [vmem:[#allocation0] ss:$8 sm:$0x3] %vm23_vm3, %v22_v11  }
  0x7f   :  { %31 = vst.msk [vmem:[#allocation0] ss:$8 sm:$0x3] %vm30_vm4, %v29_v13  }
  0x80   :  { %38 = vst.msk [vmem:[#allocation0] ss:$8 sm:$0x3] %vm37_vm5, %v36_v8  }
  0x81   :  { %45 = vst.msk [vmem:[#allocation0] ss:$8 sm:$0x3] %vm44_vm6, %v43_v9  }
  0x84   :  { %v50_v14 = vpop.permute.xlu0 %49  }
  0x85   :  { %52 = vst.msk [vmem:[#allocation0] ss:$8 sm:$0x3] %vm51_vm7, %v50_v14  }
  0x8c   :  { %v55_v15 = vld [vmem:[#allocation0] sm:$0x1]  ;;  %v60_v16 = vld [vmem:[#allocation0 + $0x8] sm:$0x1] }
  0x8d   :  { %58 = vst [vmem:[%s128_s1] sm:$0x1] %v55_v15 }
  0x8e   :  { %72 = vst [vmem:[%s128_s1 + $0x1] sm:$0x1] %v60_v16 }

// kernel: conv_mnist_forward.1
= control target key start
LH: loop header
LB: loop body
LE: loop exit
PB: predicated region body
PF: predicated region fallthrough
CT: control target
= control target key end

     0   :  { %s3592_s0 = inlined_call_operand.vmem [shape: f32[2,30,30], index: 0, kind: input, shape index: {}]   ;;  %s3593_s1 = inlined_call_operand.vmem [shape: f32[3,30,224], index: 1, kind: input, shape index: {}]   ;;  %s3594_s2 = inlined_call_operand.vmem [shape: f32[2,224], index: 2, kind: input, shape index: {}]   ;;  %s3595_s3 = inlined_call_operand.vmem [shape: f32[2,16,28], index: 3, kind: input, shape index: {}]   ;;  %s3596_s4 = inlined_call_operand.vmem [shape: f32[2,224,128], index: 4, kind: input, shape index: {}]   ;;  %s3597_s5 = inlined_call_operand.vmem [shape: f32[3,128,224], index: 5, kind: input, shape index: {}]   ;;  %s3598_s6 = inlined_call_operand.vmem [shape: f32[2,224], index: 6, kind: input, shape index: {}]   ;;  %s3599_s7 = inlined_call_operand.vmem [shape: f32[2,7,14], index: 7, kind: input, shape index: {}]   ;;  %s3600_s8 = inlined_call_operand.vmem [shape: f32[2,224,112], index: 8, kind: input, shape index: {}]   ;;  %s3601_s9 = inlined_call_operand.vmem [shape: f32[7,112,32], index: 9, kind: input, shape index: {}]   ;;  %s3602_s10 = inlined_call_operand.vmem [shape: f32[2,32], index: 10, kind: input, shape index: {}]   ;;  %s3603_s11 = inlined_call_operand.vmem [shape: f32[32,128], index: 11, kind: input, shape index: {}]   ;;  %s3604_s12 = inlined_call_operand.vmem [shape: f32[1,128], index: 12, kind: input, shape index: {}]   ;;  %s3605_s13 = inlined_call_operand.hbm [shape: f32[2,1,128], index: 13, kind: output, shape index: {}]  }
   0x1   :  { %3609 = sst [smem:[#allocation8_spill]] %s3592_s0 }
   0x2   :  { %18 = vsyncpa [#allocation3], 0 }
   0x3   :  { %20 = vsyncpa [#allocation3 + $0x1], 0  ;;  %s2390_s25 = smov 0   ;;  %s2392_s26 = smov 0  }
   0x4   :  { %s2394_s27 = smov 0   ;;  %s2396_s28 = smov 0  }
   0x5 LB: > { %3610 = sst [smem:[#allocation5_spill]] %s2314_s27  ;;  %s2411_s29 = sadd.s32 4294967295, %s2318_s28   ;;  %s2318_s28 = sphi %s2396_s28, %s3616_s28   ;;  %s2314_s27 = sphi %s2394_s27, %s3618_s27   ;;  %s2310_s26 = sphi %s2392_s26, %s3620_s26   ;;  %s2306_s25 = sphi %s2390_s25, %s3619_s25  }
   0x6   : > { %s1919_s30 = sadd.s32 4294967294, %s2318_s28   ;;  %s2415_s14 = sadd.s32 1, %s2318_s28  }
   0x7   : > { %3611 = sst [smem:[#allocation6_spill]] %s2415_s14  ;;  %s311_s15 = sadd.s32 1, %s2314_s27 }
   0x8   : > { %s308_s16 = ssub.s32 %s2318_s28, %s2415_s14  ;;  %p321_p0 = scmp.ne.s32.totalorder %s2314_s27, %s2310_s26 }
   0x9   : > { %p309_p1 = scmp.eq.s32.totalorder %s308_s16, 0  ;;  %p322_p2 = scmp.eq.s32.totalorder %s2411_s29, 1 }
   0xa   : > { %p327_p3 = scmp.ne.s32.totalorder %s2310_s26, %s2306_s25  ;;  %p328_p4 = scmp.eq.s32.totalorder %s1919_s30, 1 }
   0xb   : > { %s2426_s17 = scalar_select %p309_p1, %s2314_s27, %s311_s15  }
   0xc   : > { %p2428_p5 = por %p322_p2, %p321_p0  ;;  %p2432_p6 = por %p328_p4, %p327_p3 }
   0xd   : > { %3612 = sst [smem:[#allocation7_spill]] %s2426_s17  ;;  %p1922_p7 = scmp.ge.s32.totalorder %s2318_s28, 1 }
   0xe   : > { %p390_p8 = scmp.lt.s32.totalorder %s2318_s28, 3 }
  0x10   : > { %p391_p9 = pnand %p1922_p7, %p390_p8 }
  0x11   : > { %p433_p10 = scmp.lt.s32.totalorder (!%p391_p9), %s2411_s29, 1  ;;  %s3615_s0 = sld [smem:[#allocation8_spill]] (!%p391_p9) }
  0x12   : > { %394 = sbr.rel (%p391_p9) target bundleno = 1254 (0x4e6), region = 72  ;;  %s431_s16 = sand.u32 (!%p391_p9), 1, %s2310_s26  }
  0x13   : > { %s1860_s27 = scalar_lea.hbm (!%p391_p9), %s3605_s13, %s2411_s29  ;;  %s432_s23 = scalar_lea.vmem (!%p391_p9), [#allocation2], %s431_s16 }
  0x14   : > { %s1862_s24 = sshll.u32 (!%p391_p9), %s432_s23, 4  ;;  %s1864_s14 = sshll.u32 (!%p391_p9), %s1860_s27, 4  ;;  %s1863_s24 = int_to_ptr.vmem [resolvable:$true] %s1862_s24  ;;  %s1865_s14 = int_to_ptr.hbm [resolvable:$true] %s1864_s14 }
  0x15   : > { %s1852_s15 = scalar_lea.sflag (!%p391_p9), [#allocation3], %s431_s16 }
  0x17   : > { %v448_v0 = vld [vmem:[%s3593_s1 + $0x30] sm:$0x3f]  ;;  %vm480_vm0 = vcmask 1045504   ;;  %v449_v1 = vld [vmem:[%s3593_s1 + $0x38] sm:$0x3f]  ;;  %v446_v2 = vld [vmem:[%s3593_s1 + $0x20] sm:$0xff] }
  0x18   : > { %1943 = vmatpush.msk.msra.mxu2 %vm480_vm0, %v448_v0  ;;  %1948 = vmatpush.msk.msra.mxu3 %vm480_vm0, %v449_v1  ;;  %v1931_v3 = vld [vmem:[%s3593_s1 + $0x70] sm:$0x3f]  ;;  %v1932_v4 = vld [vmem:[%s3593_s1 + $0x78] sm:$0x3f]  ;;  %v447_v5 = vld [vmem:[%s3593_s1 + $0x28] sm:$0xff]  ;;  %s434_s30 = scalar_select %p433_p10, %s2411_s29, 1 }
  0x19   : > { %1933 = vmatpush.msk.msra.mxu0 %vm480_vm0, %v1931_v3  ;;  %1938 = vmatpush.msk.msra.mxu1 %vm480_vm0, %v1932_v4  ;;  %v1929_v6 = vld [vmem:[%s3593_s1 + $0x60] sm:$0xff]  ;;  %v1930_v7 = vld [vmem:[%s3593_s1 + $0x68] sm:$0xff]  ;;  %v444_v8 = vld [vmem:[%s3593_s1 + $0x10] sm:$0xff]  ;;  %vm471_vm1 = vcmask 244736   ;;  %vm463_vm2 = vcmask 1046528   ;;  %vm759_vm3 = vcmask 1043456  }
  0x1a   : > { %572 = vmatpush.msra.mxu2 %v446_v2  ;;  %601 = vmatpush.msra.mxu3 %v447_v5  ;;  %v445_v9 = vld [vmem:[%s3593_s1 + $0x18] sm:$0xff]  ;;  %v1927_v10 = vld [vmem:[%s3593_s1 + $0x50] sm:$0xff]  ;;  %v442_v12 = vld [vmem:[%s3593_s1] sm:$0xff]  ;;  %s2216_s17 = sshll.u32 %s434_s30, 5  ;;  %vm752_vm4 = vcmask 228352   ;;  %vm899_vm5 = vcmask 785408  }
  0x1b   : > { %v1928_v11 = vld [vmem:[%s3593_s1 + $0x58] sm:$0xff]  ;;  %500 = vmatpush.msra.mxu0 %v1929_v6  ;;  %529 = vmatpush.msra.mxu1 %v1930_v7  ;;  %v443_v13 = vld [vmem:[%s3593_s1 + $0x8] sm:$0xff]  ;;  %s2489_s22 = scalar_lea.vmem %s3615_s0, %s2216_s17  ;;  %v1925_v14 = vld [vmem:[%s3593_s1 + $0x40] sm:$0xff]  ;;  %vm1307_vm6 = vcmask 113664   ;;  %vm1576_vm7 = vcmask 916480   ;;  %vm1826_vm8 = vcmask 261120  }
  0x1c   : > { %573 = vmatpush.msra.mxu2 %v444_v8  ;;  %602 = vmatpush.msra.mxu3 %v445_v9  ;;  %v1926_v15 = vld [vmem:[%s3593_s1 + $0x48] sm:$0xff]  ;;  %v1959_v16 = vld [vmem:[%s3593_s1 + $0xb0] sm:$0x3f]  ;;  %v438_v17 = vld [vmem:[%s2489_s22] sm:$0xff]  ;;  %s2270_s30 = sshra.s32 %s1865_s14, 4  ;;  %s2276_s17 = scalar_lea.hbm %s3605_s13, 2  ;;  %s2271_s30 = int_to_ptr.hbm [resolvable:$true] %s2270_s30 }
  0x1d   : > { %501 = vmatpush.msra.mxu0 %v1927_v10  ;;  %530 = vmatpush.msra.mxu1 %v1928_v11  ;;  %v439_v18 = vld [vmem:[%s2489_s22 + $0x8] sm:$0xff]  ;;  %v1960_v19 = vld [vmem:[%s3593_s1 + $0xb8] sm:$0x3f]  ;;  %v464_v20 = vrot.slane %v438_v17, 1  ;;  %v440_v22 = vld [vmem:[%s2489_s22 + $0x10] sm:$0xff]  ;;  %v626_v35 = vrot.slane %v438_v17, 2  ;;  %p2277_p0 = scmp.lt.s32.totalorder %s2271_s30, %s3605_s13 }
  0x1e   : > { %574 = vmatpush.msra.mxu2 %v442_v12  ;;  %603 = vmatpush.msra.mxu3 %v443_v13  ;;  %v465_v21 = vrot.slane %v439_v18, 1  ;;  %v1957_v23 = vld [vmem:[%s3593_s1 + $0xa0] sm:$0xff]  ;;  %v1958_v24 = vld [vmem:[%s3593_s1 + $0xa8] sm:$0xff]  ;;  %v1955_v26 = vld [vmem:[%s3593_s1 + $0x90] sm:$0xff]  ;;  %v467_v28 = vrot.slane %v440_v22, 1  ;;  %v627_v36 = vrot.slane %v439_v18, 2 }
  0x1f   : > { %1944 = vmatmul.msk.f32.vlgmr.msra.gmra.mxu2 %vm471_vm1, %v438_v17  ;;  %1949 = vmatmul.msk.f32.vlgmr.msra.gmra.mxu3 %vm471_vm1, %v438_v17  ;;  %v1956_v27 = vld [vmem:[%s3593_s1 + $0x98] sm:$0xff]  ;;  %v1953_v29 = vld [vmem:[%s3593_s1 + $0x80] sm:$0xff]  ;;  %v1954_v30 = vld [vmem:[%s3593_s1 + $0x88] sm:$0xff]  ;;  %v629_v38 = vrot.slane %v440_v22, 2  ;;  %s2272_s0 = scalar_lea.hbm %s2271_s30, 1 }
  0x20   : > { %502 = vmatpush.msra.mxu0 %v1925_v14  ;;  %531 = vmatpush.msra.mxu1 %v1926_v15  ;;  %v466_v25 = vsel %vm463_vm2, %v464_v20, %v465_v21  ;;  %v468_v31 = vsel %vm463_vm2, %v465_v21, %v467_v28  ;;  %v441_v32 = vld [vmem:[%s2489_s22 + $0x18] sm:$0x3f]  ;;  %v628_v37 = vsel %vm480_vm0, %v626_v35, %v627_v36  ;;  %v713_v0 = vld [vmem:[%s3594_s2] ss:$2 sm:$0x3]  ;;  %p2273_p11 = scmp.ne.s32.totalorder %s2271_s30, %s2272_s0  ;;  %p2278_p1 = scmp.lt.s32.totalorder %s2276_s17, %s2272_s0 }
  0x21   : > { %1934 = vmatmul.msk.f32.vlgmr.msra.gmra.mxu0 %vm471_vm1, %v466_v25  ;;  %1939 = vmatmul.msk.f32.vlgmr.msra.gmra.mxu1 %vm471_vm1, %v466_v25  ;;  %v469_v33 = vrot.slane %v441_v32, 1  ;;  %v630_v39 = vsel %vm480_vm0, %v627_v36, %v629_v38  ;;  %v631_v40 = vrot.slane %v441_v32, 2  ;;  %v715_v9 = vperm.slane %v713_v0, 0  ;;  %v1971_v15 = vld [vmem:[%s3594_s2 + $0x1] ss:$2 sm:$0x3] }
  0x22   : > { %1961 = vmatpush.msk.msrb.mxu0 %vm480_vm0, %v1959_v16  ;;  %1966 = vmatpush.msk.msrb.mxu1 %vm480_vm0, %v1960_v19  ;;  %v716_v10 = vperm.slane %v713_v0, 1  ;;  %v731_v25 = vperm.slane %v1971_v15, 1  ;;  %v1978_v0 = vld [vmem:[%s3595_s3 + $0x10] sm:$0xff]  ;;  %p2274_p12 = pnand %p2273_p11, %p2428_p5  ;;  %p2279_p2 = por %p2278_p1, %p2277_p0 }
  0x23   : > { %v470_v34 = vsel %vm463_vm2, %v467_v28, %v469_v33  ;;  %v632_v41 = vsel %vm480_vm0, %v629_v38, %v631_v40 }
  0x24   : > { %660 = vmatpush.msrb.mxu0 %v1957_v23  ;;  %689 = vmatpush.msrb.mxu1 %v1958_v24  ;;  %v730_v24 = vperm.slane %v1971_v15, 0  ;;  %v2011_v15 = vld [vmem:[%s3596_s4 + $0x198] sm:$0xff]  ;;  %p2275_p13 = pneg %p2274_p12 }
  0x26   : > { %661 = vmatpush.msrb.mxu0 %v1955_v26  ;;  %690 = vmatpush.msrb.mxu1 %v1956_v27  ;;  %p2280_p3 = pnand %p2279_p2, %p2275_p13 }
  0x27   : > { %1945 = vmatmul.msk.f32.gmra.mxu2 %vm471_vm1, %v439_v18  ;;  %1950 = vmatmul.msk.f32.gmra.mxu3 %vm471_vm1, %v439_v18 }
  0x28   : > { %662 = vmatpush.msrb.mxu0 %v1953_v29  ;;  %691 = vmatpush.msrb.mxu1 %v1954_v30 }
  0x29   : > { %1935 = vmatmul.msk.f32.gmra.mxu0 %vm471_vm1, %v468_v31  ;;  %1940 = vmatmul.msk.f32.gmra.mxu1 %vm471_vm1, %v468_v31 }
  0x2f   : > { %1946 = vmatmul.msk.f32.gmra.mxu2 %vm471_vm1, %v440_v22  ;;  %1951 = vmatmul.msk.f32.gmra.mxu3 %vm471_vm1, %v440_v22 }
  0x31   : > { %1936 = vmatmul.msk.f32.gmra.mxu0 %vm471_vm1, %v470_v34  ;;  %1941 = vmatmul.msk.f32.gmra.mxu1 %vm471_vm1, %v470_v34 }
  0x37   : > { %1947 = vmatmul.msk.f32.gmra.mxu2 %vm471_vm1, %v441_v32  ;;  %1952 = vmatmul.msk.f32.gmra.mxu3 %vm471_vm1, %v441_v32 }
  0x39   : > { %1937 = vmatmul.msk.f32.gmra.mxu0 %vm471_vm1, %v469_v33  ;;  %1942 = vmatmul.msk.f32.gmra.mxu1 %vm471_vm1, %v469_v33 }
  0x41   : > { %1962 = vmatmul.msk.f32.vlgmr.msrb.gmra.mxu0 %vm471_vm1, %v628_v37  ;;  %1967 = vmatmul.msk.f32.vlgmr.msrb.gmra.mxu1 %vm471_vm1, %v628_v37 }
  0x49   : > { %1963 = vmatmul.msk.f32.gmra.mxu0 %vm471_vm1, %v630_v39  ;;  %1968 = vmatmul.msk.f32.gmra.mxu1 %vm471_vm1, %v630_v39 }
  0x51   : > { %1964 = vmatmul.msk.f32.gmra.mxu0 %vm471_vm1, %v632_v41  ;;  %1969 = vmatmul.msk.f32.gmra.mxu1 %vm471_vm1, %v632_v41 }
  0x59   : > { %1965 = vmatmul.msk.f32.gmra.mxu0 %vm471_vm1, %v631_v40  ;;  %1970 = vmatmul.msk.f32.gmra.mxu1 %vm471_vm1, %v631_v40  ;;  %v886_v40 = vld [vmem:[%s3596_s4 + $0x78] sm:$0xff] }
  0x5a   : > { %906 = vmatpush.msra.mxu0 %v886_v40  ;;  %v871_v40 = vld [vmem:[%s3596_s4] sm:$0xff] }
  0x9e   : > { %v504_v42 = vpop.f32.mrf.mxu0  ;;  %v533_v43 = vpop.f32.mrf.mxu1 }
  0xa2   : > { %v576_v48 = vpop.f32.mrf.mxu2  ;;  %v605_v49 = vpop.f32.mrf.mxu3 }
  0xa3   : > { %v577_v7 = vadd.f32 %v576_v48, %v504_v42  ;;  %v606_v8 = vadd.f32 %v605_v49, %v533_v43  ;;  %v884_v48 = vld [vmem:[%s3596_s4 + $0x68] sm:$0xff]  ;;  %v898_v49 = vld [vmem:[%s3596_s4 + $0xd8] sm:$0xff] }
  0xa4   : > { %933 = vmatpush.msra.mxu1 %v898_v49  ;;  %v2045_v49 = vld [vmem:[%s3597_s5 + $0x1d8] sm:$0xff] }
  0xa6   : > { %v507_v44 = vpop.f32.mrf.mxu0  ;;  %v536_v45 = vpop.f32.mrf.mxu1 }
  0xaa   : > { %v579_v52 = vpop.f32.mrf.mxu2  ;;  %v608_v53 = vpop.f32.mrf.mxu3 }
  0xab   : > { %v580_v3 = vadd.f32 %v579_v52, %v507_v44  ;;  %v609_v4 = vadd.f32 %v608_v53, %v536_v45  ;;  %v885_v45 = vld [vmem:[%s3596_s4 + $0x70] sm:$0xff]  ;;  %v750_v53 = vld [vmem:[%s3595_s3] sm:$0xff] }
  0xac   : > { %907 = vmatpush.msra.mxu0 %v885_v45  ;;  %v2049_v45 = vld [vmem:[%s3597_s5 + $0x1f8] sm:$0xff] }
  0xae   : > { %v510_v46 = vpop.f32.mrf.mxu0  ;;  %v539_v47 = vpop.f32.mrf.mxu1  ;;  %908 = vmatpush.msra.mxu0 %v884_v48  ;;  %v2044_v48 = vld [vmem:[%s3597_s5 + $0x1d0] sm:$0xff] }
  0xb2   : > { %v582_v58 = vpop.f32.mrf.mxu2  ;;  %v611_v59 = vpop.f32.mrf.mxu3 }
  0xb3   : > { %v583_v62 = vadd.f32 %v582_v58, %v510_v46  ;;  %v612_v63 = vadd.f32 %v611_v59, %v539_v47  ;;  %v2003_v58 = vld [vmem:[%s3596_s4 + $0x158] sm:$0xff] }
  0xb4   : > { %v2015_v59 = vld [vmem:[%s3596_s4 + $0x1b8] sm:$0xff] }
  0xb6   : > { %v513_v50 = vpop.f32.mrf.mxu0  ;;  %v542_v51 = vpop.f32.mrf.mxu1 }
  0xba   : > { %v585_v1 = vpop.f32.mrf.mxu2  ;;  %v614_v2 = vpop.f32.mrf.mxu3 }
  0xbb   : > { %v586_v11 = vadd.f32 %v585_v1, %v513_v50  ;;  %v615_v12 = vadd.f32 %v614_v2, %v542_v51  ;;  %v897_v50 = vld [vmem:[%s3596_s4 + $0xd0] sm:$0xff]  ;;  %v1999_v1 = vld [vmem:[%s3596_s4 + $0x138] sm:$0xff] }
  0xbc   : > { %934 = vmatpush.msra.mxu1 %v897_v50  ;;  %v1998_v2 = vld [vmem:[%s3596_s4 + $0x130] sm:$0xff] }
  0xbd   : > { %v1059_v50 = vld [vmem:[%s3597_s5 + $0xf0] sm:$0xff] }
  0xbe   : > { %v664_v54 = vpop.f32.mrf.mxu0  ;;  %v693_v55 = vpop.f32.mrf.mxu1 }
  0xbf   : > { %v705_v16 = vadd.f32 %v664_v54, %v577_v7  ;;  %v706_v17 = vadd.f32 %v693_v55, %v606_v8  ;;  %v883_v54 = vld [vmem:[%s3596_s4 + $0x60] sm:$0xff]  ;;  %v882_v55 = vld [vmem:[%s3596_s4 + $0x58] sm:$0xff]  ;;  %v2013_v7 = vld [vmem:[%s3596_s4 + $0x1a8] sm:$0xff] }
  0xc0   : > { %909 = vmatpush.msra.mxu0 %v883_v54  ;;  %v879_v8 = vld [vmem:[%s3596_s4 + $0x40] sm:$0xff] }
  0xc1   : > { %v719_v30 = vmul.f32 %v715_v9, %v705_v16  ;;  %v720_v31 = vmul.f32 %v716_v10, %v706_v17  ;;  %v877_v16 = vld [vmem:[%s3596_s4 + $0x30] sm:$0xff] }
  0xc2   : > { %910 = vmatpush.msra.mxu0 %v882_v55  ;;  %v893_v17 = vld [vmem:[%s3596_s4 + $0xb0] sm:$0xff] }
  0xc3   : > { %v734_v43 = vadd.f32 %v730_v24, %v719_v30  ;;  %v735_v44 = vadd.f32 %v731_v25, %v720_v31  ;;  %v1991_v30 = vld [vmem:[%s3596_s4 + $0xf8] sm:$0xff] }
  0xc4   : > { %v2007_v31 = vld [vmem:[%s3596_s4 + $0x178] sm:$0xff] }
  0xc5   : > { %v742_v51 = vmax.f32 %v734_v43, 0.0  ;;  %v743_v52 = vmax.f32 %v735_v44, 0.0  ;;  %v2004_v43 = vld [vmem:[%s3596_s4 + $0x160] sm:$0xff]  ;;  %v2048_v44 = vld [vmem:[%s3597_s5 + $0x1f0] sm:$0xff] }
  0xc6   : > { %v667_v56 = vpop.f32.mrf.mxu0  ;;  %v696_v57 = vpop.f32.mrf.mxu1 }
  0xc7   : > { %v707_v13 = vadd.f32 %v667_v56, %v580_v3  ;;  %v708_v14 = vadd.f32 %v696_v57, %v609_v4  ;;  %v881_v56 = vld [vmem:[%s3596_s4 + $0x50] sm:$0xff]  ;;  %v751_v57 = vld [vmem:[%s3595_s3 + $0x8] sm:$0xff]  ;;  %v1979_v3 = vld [vmem:[%s3595_s3 + $0x18] sm:$0xff] }
  0xc8   : > { %911 = vmatpush.msra.mxu0 %v881_v56  ;;  %v880_v4 = vld [vmem:[%s3596_s4 + $0x48] sm:$0xff]  ;;  %v2042_v56 = vld [vmem:[%s3597_s5 + $0x1c0] sm:$0xff] }
  0xc9   : > { %v721_v26 = vmul.f32 %v715_v9, %v707_v13  ;;  %v722_v27 = vmul.f32 %v716_v10, %v708_v14  ;;  %v894_v13 = vld [vmem:[%s3596_s4 + $0xb8] sm:$0xff] }
  0xca   : > { %912 = vmatpush.msra.mxu0 %v880_v4  ;;  %v1995_v14 = vld [vmem:[%s3596_s4 + $0x118] sm:$0xff]  ;;  %v2036_v4 = vld [vmem:[%s3597_s5 + $0x190] sm:$0xff] }
  0xcb   : > { %v736_v38 = vadd.f32 %v730_v24, %v721_v26  ;;  %v737_v39 = vadd.f32 %v731_v25, %v722_v27  ;;  %v1992_v26 = vld [vmem:[%s3596_s4 + $0x100] sm:$0xff] }
  0xcc   : > { %913 = vmatpush.msra.mxu0 %v879_v8  ;;  %v2008_v27 = vld [vmem:[%s3596_s4 + $0x180] sm:$0xff] }
  0xcd   : > { %v744_v46 = vmax.f32 %v736_v38, 0.0  ;;  %v745_v47 = vmax.f32 %v737_v39, 0.0  ;;  %v1989_v38 = vld [vmem:[%s3596_s4 + $0xe8] sm:$0xff] }
  0xce   : > { %v670_v60 = vpop.f32.mrf.mxu0  ;;  %v699_v61 = vpop.f32.mrf.mxu1  ;;  %v2005_v39 = vld [vmem:[%s3596_s4 + $0x168] sm:$0xff] }
  0xcf   : > { %v709_v5 = vadd.f32 %v670_v60, %v583_v62  ;;  %v710_v6 = vadd.f32 %v699_v61, %v612_v63  ;;  %v2002_v60 = vld [vmem:[%s3596_s4 + $0x150] sm:$0xff]  ;;  %v2001_v62 = vld [vmem:[%s3596_s4 + $0x148] sm:$0xff]  ;;  %v2000_v63 = vld [vmem:[%s3596_s4 + $0x140] sm:$0xff] }
  0xd0   : > { %v2014_v61 = vld [vmem:[%s3596_s4 + $0x1b0] sm:$0xff] }
  0xd1   : > { %v723_v20 = vmul.f32 %v715_v9, %v709_v5  ;;  %v724_v21 = vmul.f32 %v716_v10, %v710_v6  ;;  %v896_v5 = vld [vmem:[%s3596_s4 + $0xc8] sm:$0xff] }
  0xd2   : > { %v1997_v6 = vld [vmem:[%s3596_s4 + $0x128] sm:$0xff]  ;;  %935 = vmatpush.msra.mxu1 %v896_v5  ;;  %v2037_v5 = vld [vmem:[%s3597_s5 + $0x198] sm:$0xff] }
  0xd3   : > { %v738_v34 = vadd.f32 %v730_v24, %v723_v20  ;;  %v739_v35 = vadd.f32 %v731_v25, %v724_v21  ;;  %v876_v20 = vld [vmem:[%s3596_s4 + $0x28] sm:$0xff] }
  0xd4   : > { %v892_v21 = vld [vmem:[%s3596_s4 + $0xa8] sm:$0xff] }
  0xd5   : > { %v746_v41 = vmax.f32 %v738_v34, 0.0  ;;  %v747_v42 = vmax.f32 %v739_v35, 0.0  ;;  %v1990_v34 = vld [vmem:[%s3596_s4 + $0xf0] sm:$0xff] }
  0xd6   : > { %v673_v18 = vpop.f32.mrf.mxu0  ;;  %v702_v19 = vpop.f32.mrf.mxu1  ;;  %v2006_v35 = vld [vmem:[%s3596_s4 + $0x170] sm:$0xff] }
  0xd7   : > { %v711_v22 = vadd.f32 %v673_v18, %v586_v11  ;;  %v712_v23 = vadd.f32 %v702_v19, %v615_v12  ;;  %v2012_v11 = vld [vmem:[%s3596_s4 + $0x1a0] sm:$0xff]  ;;  %v878_v12 = vld [vmem:[%s3596_s4 + $0x38] sm:$0xff]  ;;  %v1994_v18 = vld [vmem:[%s3596_s4 + $0x110] sm:$0xff] }
  0xd8   : > { %914 = vmatpush.msra.mxu0 %v878_v12  ;;  %v2010_v19 = vld [vmem:[%s3596_s4 + $0x190] sm:$0xff] }
  0xd9   : > { %v725_v28 = vmul.f32 %v715_v9, %v711_v22  ;;  %v726_v29 = vmul.f32 %v716_v10, %v712_v23  ;;  %v895_v9 = vld [vmem:[%s3596_s4 + $0xc0] sm:$0xff]  ;;  %v1993_v22 = vld [vmem:[%s3596_s4 + $0x108] sm:$0xff]  ;;  %v1047_v12 = vld [vmem:[%s3597_s5 + $0x90] sm:$0xff] }
  0xda   : > { %v1996_v10 = vld [vmem:[%s3596_s4 + $0x120] sm:$0xff]  ;;  %936 = vmatpush.msra.mxu1 %v895_v9  ;;  %915 = vmatpush.msra.mxu0 %v877_v16  ;;  %v2009_v23 = vld [vmem:[%s3596_s4 + $0x188] sm:$0xff] }
  0xdb   : > { %v740_v32 = vadd.f32 %v730_v24, %v725_v28  ;;  %v741_v33 = vadd.f32 %v731_v25, %v726_v29  ;;  %v875_v24 = vld [vmem:[%s3596_s4 + $0x20] sm:$0xff]  ;;  %v874_v28 = vld [vmem:[%s3596_s4 + $0x18] sm:$0xff] }
  0xdc   : > { %937 = vmatpush.msra.mxu1 %v894_v13  ;;  %916 = vmatpush.msra.mxu0 %v876_v20  ;;  %v891_v25 = vld [vmem:[%s3596_s4 + $0xa0] sm:$0xff]  ;;  %v890_v29 = vld [vmem:[%s3596_s4 + $0x98] sm:$0xff]  ;;  %v1043_v20 = vld [vmem:[%s3597_s5 + $0x70] sm:$0xff] }
  0xdd   : > { %v748_v36 = vmax.f32 %v740_v32, 0.0  ;;  %v749_v37 = vmax.f32 %v741_v33, 0.0  ;;  %v873_v32 = vld [vmem:[%s3596_s4 + $0x10] sm:$0xff]  ;;  %v1048_v13 = vld [vmem:[%s3597_s5 + $0x98] sm:$0xff]  ;;  %v1045_v16 = vld [vmem:[%s3597_s5 + $0x80] sm:$0xff] }
  0xde   : > { %938 = vmatpush.msra.mxu1 %v893_v17  ;;  %917 = vmatpush.msra.mxu0 %v875_v24  ;;  %v889_v33 = vld [vmem:[%s3596_s4 + $0x90] sm:$0xff]  ;;  %v1046_v17 = vld [vmem:[%s3597_s5 + $0x88] sm:$0xff]  ;;  %v1041_v24 = vld [vmem:[%s3597_s5 + $0x60] sm:$0xff] }
  0xdf   : > { %1972 = vmatpush.msk.msrb.mxu2 %vm759_vm3, %v748_v36  ;;  %1975 = vmatpush.msk.msrb.mxu3 %vm759_vm3, %v749_v37 }
  0xe0   : > { %939 = vmatpush.msra.mxu1 %v892_v21  ;;  %918 = vmatpush.msra.mxu0 %v874_v28  ;;  %v1044_v21 = vld [vmem:[%s3597_s5 + $0x78] sm:$0xff] }
  0xe1   : > { %779 = vmatpush.msrb.mxu2 %v746_v41  ;;  %802 = vmatpush.msrb.mxu3 %v747_v42 }
  0xe2   : > { %940 = vmatpush.msra.mxu1 %v891_v25  ;;  %919 = vmatpush.msra.mxu0 %v873_v32  ;;  %v1042_v25 = vld [vmem:[%s3597_s5 + $0x68] sm:$0xff] }
  0xe3   : > { %780 = vmatpush.msrb.mxu2 %v744_v46  ;;  %803 = vmatpush.msrb.mxu3 %v745_v47 }
  0xe4   : > { %941 = vmatpush.msra.mxu1 %v890_v29 }
  0xe5   : > { %781 = vmatpush.msrb.mxu2 %v742_v51  ;;  %804 = vmatpush.msrb.mxu3 %v743_v52 }
  0xe6   : > { %1973 = vmatmul.msk.f32.vlgmr.msrb.gmra.mxu2 %vm752_vm4, %v750_v53  ;;  %1976 = vmatmul.msk.f32.vlgmr.msrb.gmra.mxu3 %vm752_vm4, %v750_v53  ;;  %v1058_v53 = vld [vmem:[%s3597_s5 + $0xe8] sm:$0xff] }
  0xe7   : > { %1980 = vmatpush.msk.msra.mxu2 %vm759_vm3, %v748_v36  ;;  %1983 = vmatpush.msk.msra.mxu3 %vm759_vm3, %v749_v37  ;;  %v872_v36 = vld [vmem:[%s3596_s4 + $0x8] sm:$0xff] }
  0xe8   : > { %942 = vmatpush.msra.mxu1 %v889_v33  ;;  %v888_v37 = vld [vmem:[%s3596_s4 + $0x88] sm:$0xff]  ;;  %920 = vmatpush.msra.mxu0 %v872_v36  ;;  %v2024_v36 = vld [vmem:[%s3597_s5 + $0x130] sm:$0xff] }
  0xe9   : > { %834 = vmatpush.msra.mxu2 %v746_v41  ;;  %857 = vmatpush.msra.mxu3 %v747_v42  ;;  %v887_v41 = vld [vmem:[%s3596_s4 + $0x80] sm:$0xff] }
  0xea   : > { %943 = vmatpush.msra.mxu1 %v888_v37  ;;  %v1988_v42 = vld [vmem:[%s3596_s4 + $0xe0] sm:$0xff]  ;;  %921 = vmatpush.msra.mxu0 %v871_v40  ;;  %v2025_v37 = vld [vmem:[%s3597_s5 + $0x138] sm:$0xff] }
  0xeb   : > { %835 = vmatpush.msra.mxu2 %v744_v46  ;;  %858 = vmatpush.msra.mxu3 %v745_v47  ;;  %v2046_v46 = vld [vmem:[%s3597_s5 + $0x1e0] sm:$0xff]  ;;  %v2047_v47 = vld [vmem:[%s3597_s5 + $0x1e8] sm:$0xff] }
  0xec   : > { %944 = vmatpush.msra.mxu1 %v887_v41  ;;  %1101 = vmatpush.msrb.mxu0 %v2048_v44  ;;  %v2022_v40 = vld [vmem:[%s3597_s5 + $0x120] sm:$0xff]  ;;  %v2023_v41 = vld [vmem:[%s3597_s5 + $0x128] sm:$0xff]  ;;  %v2020_v44 = vld [vmem:[%s3597_s5 + $0x110] sm:$0xff] }
  0xed   : > { %836 = vmatpush.msra.mxu2 %v742_v51  ;;  %859 = vmatpush.msra.mxu3 %v743_v52  ;;  %v1060_v51 = vld [vmem:[%s3597_s5 + $0xf8] sm:$0xff]  ;;  %v1057_v52 = vld [vmem:[%s3597_s5 + $0xe0] sm:$0xff] }
  0xee   : > { %1974 = vmatmul.msk.f32.gmra.mxu2 %vm752_vm4, %v751_v57  ;;  %1977 = vmatmul.msk.f32.gmra.mxu3 %vm752_vm4, %v751_v57  ;;  %v2043_v57 = vld [vmem:[%s3597_s5 + $0x1c8] sm:$0xff] }
  0xef   : > { %981 = vmatpush.msrb.mxu2 %v2003_v58  ;;  %1008 = vmatpush.msrb.mxu3 %v2015_v59  ;;  %v1055_v58 = vld [vmem:[%s3597_s5 + $0xd0] sm:$0xff]  ;;  %v1056_v59 = vld [vmem:[%s3597_s5 + $0xd8] sm:$0xff] }
  0xf0   : > { %1124 = vmatpush.msrb.mxu1 %v2049_v45  ;;  %1102 = vmatpush.msrb.mxu0 %v2046_v46  ;;  %v2021_v45 = vld [vmem:[%s3597_s5 + $0x118] sm:$0xff]  ;;  %v1035_v46 = vld [vmem:[%s3597_s5 + $0x30] sm:$0xff] }
  0xf1   : > { %982 = vmatpush.msrb.mxu2 %v2002_v60  ;;  %1009 = vmatpush.msrb.mxu3 %v2014_v61  ;;  %v2040_v60 = vld [vmem:[%s3597_s5 + $0x1b0] sm:$0xff]  ;;  %v2041_v61 = vld [vmem:[%s3597_s5 + $0x1b8] sm:$0xff] }
  0xf2   : > { %1125 = vmatpush.msrb.mxu1 %v2047_v47  ;;  %1103 = vmatpush.msrb.mxu0 %v2044_v48  ;;  %v1036_v47 = vld [vmem:[%s3597_s5 + $0x38] sm:$0xff]  ;;  %v2018_v48 = vld [vmem:[%s3597_s5 + $0x100] sm:$0xff] }
  0xf3   : > { %983 = vmatpush.msrb.mxu2 %v2001_v62  ;;  %1010 = vmatpush.msrb.mxu3 %v2013_v7  ;;  %v1053_v62 = vld [vmem:[%s3597_s5 + $0xc0] sm:$0xff]  ;;  %v1050_v7 = vld [vmem:[%s3597_s5 + $0xa8] sm:$0xff] }
  0xf4   : > { %1126 = vmatpush.msrb.mxu1 %v2045_v49  ;;  %1104 = vmatpush.msrb.mxu0 %v2042_v56  ;;  %v2019_v49 = vld [vmem:[%s3597_s5 + $0x108] sm:$0xff]  ;;  %v2078_v56 = vld [vmem:[%s3597_s5 + $0x2e0] sm:$0xff] }
  0xf5   : > { %984 = vmatpush.msrb.mxu2 %v2000_v63  ;;  %1011 = vmatpush.msrb.mxu3 %v2012_v11  ;;  %v1054_v63 = vld [vmem:[%s3597_s5 + $0xc8] sm:$0xff] }
  0xf6   : > { %1981 = vmatmul.msk.f32.vlgmr.msra.gmra.mxu2 %vm752_vm4, %v1978_v0  ;;  %1984 = vmatmul.msk.f32.vlgmr.msra.gmra.mxu3 %vm752_vm4, %v1978_v0  ;;  %v2038_v0 = vld [vmem:[%s3597_s5 + $0x1a0] sm:$0xff]  ;;  %v2035_v11 = vld [vmem:[%s3597_s5 + $0x188] sm:$0xff] }
  0xf7   : > { %985 = vmatpush.msrb.mxu2 %v1999_v1  ;;  %1012 = vmatpush.msrb.mxu3 %v2011_v15  ;;  %v2039_v1 = vld [vmem:[%s3597_s5 + $0x1a8] sm:$0xff]  ;;  %v2033_v15 = vld [vmem:[%s3597_s5 + $0x178] sm:$0xff] }
  0xf8   : > { %1127 = vmatpush.msrb.mxu1 %v2043_v57  ;;  %1105 = vmatpush.msrb.mxu0 %v2040_v60  ;;  %v2079_v57 = vld [vmem:[%s3597_s5 + $0x2e8] sm:$0xff]  ;;  %v2076_v60 = vld [vmem:[%s3597_s5 + $0x2d0] sm:$0xff] }
  0xf9   : > { %986 = vmatpush.msrb.mxu2 %v1998_v2  ;;  %1013 = vmatpush.msrb.mxu3 %v2010_v19  ;;  %v1051_v2 = vld [vmem:[%s3597_s5 + $0xb0] sm:$0xff]  ;;  %v2031_v19 = vld [vmem:[%s3597_s5 + $0x168] sm:$0xff] }
  0xfa   : > { %1128 = vmatpush.msrb.mxu1 %v2041_v61  ;;  %1106 = vmatpush.msrb.mxu0 %v2038_v0  ;;  %v2077_v61 = vld [vmem:[%s3597_s5 + $0x2d8] sm:$0xff]  ;;  %v2072_v0 = vld [vmem:[%s3597_s5 + $0x2b0] sm:$0xff] }
  0xfb   : > { %987 = vmatpush.msrb.mxu2 %v1997_v6  ;;  %1014 = vmatpush.msrb.mxu3 %v2009_v23  ;;  %v1049_v6 = vld [vmem:[%s3597_s5 + $0xa0] sm:$0xff]  ;;  %v2029_v23 = vld [vmem:[%s3597_s5 + $0x158] sm:$0xff] }
  0xfc   : > { %1129 = vmatpush.msrb.mxu1 %v2039_v1  ;;  %1107 = vmatpush.msrb.mxu0 %v2036_v4  ;;  %v2073_v1 = vld [vmem:[%s3597_s5 + $0x2b8] sm:$0xff]  ;;  %v2068_v4 = vld [vmem:[%s3597_s5 + $0x290] sm:$0xff] }
  0xfd   : > { %988 = vmatpush.msrb.mxu2 %v1996_v10  ;;  %1015 = vmatpush.msrb.mxu3 %v2008_v27  ;;  %v2034_v10 = vld [vmem:[%s3597_s5 + $0x180] sm:$0xff] }
  0xfe   : > { %1982 = vmatmul.msk.f32.gmra.mxu2 %vm752_vm4, %v1979_v3  ;;  %1985 = vmatmul.msk.f32.gmra.mxu3 %vm752_vm4, %v1979_v3  ;;  %v1052_v3 = vld [vmem:[%s3597_s5 + $0xb8] sm:$0xff] }
  0xff   : > { %989 = vmatpush.msrb.mxu2 %v1995_v14  ;;  %1016 = vmatpush.msrb.mxu3 %v2007_v31  ;;  %v2032_v14 = vld [vmem:[%s3597_s5 + $0x170] sm:$0xff]  ;;  %v2027_v31 = vld [vmem:[%s3597_s5 + $0x148] sm:$0xff] }
 0x100   : > { %1130 = vmatpush.msrb.mxu1 %v2037_v5  ;;  %1108 = vmatpush.msrb.mxu0 %v2034_v10  ;;  %v2069_v5 = vld [vmem:[%s3597_s5 + $0x298] sm:$0xff]  ;;  %v2062_v10 = vld [vmem:[%s3597_s5 + $0x260] sm:$0xff] }
 0x101   : > { %990 = vmatpush.msrb.mxu2 %v1994_v18  ;;  %1017 = vmatpush.msrb.mxu3 %v2006_v35  ;;  %v2030_v18 = vld [vmem:[%s3597_s5 + $0x160] sm:$0xff] }
 0x102   : > { %1131 = vmatpush.msrb.mxu1 %v2035_v11  ;;  %1109 = vmatpush.msrb.mxu0 %v2032_v14  ;;  %v2063_v11 = vld [vmem:[%s3597_s5 + $0x268] sm:$0xff]  ;;  %v2058_v14 = vld [vmem:[%s3597_s5 + $0x240] sm:$0xff] }
 0x103   : > { %991 = vmatpush.msrb.mxu2 %v1993_v22  ;;  %1018 = vmatpush.msrb.mxu3 %v2005_v39  ;;  %v2028_v22 = vld [vmem:[%s3597_s5 + $0x150] sm:$0xff]  ;;  %v1040_v39 = vld [vmem:[%s3597_s5 + $0x58] sm:$0xff] }
 0x104   : > { %1132 = vmatpush.msrb.mxu1 %v2033_v15  ;;  %1110 = vmatpush.msrb.mxu0 %v2030_v18  ;;  %v2059_v15 = vld [vmem:[%s3597_s5 + $0x248] sm:$0xff]  ;;  %v2054_v18 = vld [vmem:[%s3597_s5 + $0x220] sm:$0xff] }
 0x105   : > { %992 = vmatpush.msrb.mxu2 %v1992_v26  ;;  %1019 = vmatpush.msrb.mxu3 %v2004_v43  ;;  %v1038_v43 = vld [vmem:[%s3597_s5 + $0x48] sm:$0xff] }
 0x106   : > { %1133 = vmatpush.msrb.mxu1 %v2031_v19  ;;  %1111 = vmatpush.msrb.mxu0 %v2028_v22  ;;  %v2055_v19 = vld [vmem:[%s3597_s5 + $0x228] sm:$0xff] }
 0x107   : > { %993 = vmatpush.msrb.mxu2 %v1991_v30  ;;  %1147 = vmatpush.msra.mxu3 %v1059_v50  ;;  %v2026_v30 = vld [vmem:[%s3597_s5 + $0x140] sm:$0xff] }
 0x108   : > { %1134 = vmatpush.msrb.mxu1 %v2029_v23  ;;  %1112 = vmatpush.msrb.mxu0 %v2026_v30  ;;  %v1033_v50 = vld [vmem:[%s3597_s5 + $0x20] sm:$0xff] }
 0x109   : > { %994 = vmatpush.msrb.mxu2 %v1990_v34  ;;  %1148 = vmatpush.msra.mxu3 %v1057_v52  ;;  %v2080_v52 = vld [vmem:[%s3597_s5 + $0x2f0] sm:$0xff] }
 0x10a   : > { %1135 = vmatpush.msrb.mxu1 %v2027_v31  ;;  %1113 = vmatpush.msrb.mxu0 %v2024_v36 }
 0x10b   : > { %995 = vmatpush.msrb.mxu2 %v1989_v38  ;;  %1149 = vmatpush.msra.mxu3 %v1055_v58  ;;  %v1039_v38 = vld [vmem:[%s3597_s5 + $0x50] sm:$0xff]  ;;  %v1029_v58 = vld [vmem:[%s3597_s5] sm:$0xff] }
 0x10c   : > { %1136 = vmatpush.msrb.mxu1 %v2025_v37  ;;  %1114 = vmatpush.msrb.mxu0 %v2022_v40 }
 0x10d   : > { %996 = vmatpush.msrb.mxu2 %v1988_v42  ;;  %1150 = vmatpush.msra.mxu3 %v1053_v62  ;;  %v1037_v42 = vld [vmem:[%s3597_s5 + $0x40] sm:$0xff] }
 0x10e   : > { %1137 = vmatpush.msrb.mxu1 %v2023_v41  ;;  %1115 = vmatpush.msrb.mxu0 %v2020_v44  ;;  %v2074_v62 = vld [vmem:[%s3597_s5 + $0x2c0] sm:$0xff] }
 0x10f   : > { %1170 = vmatpush.msra.mxu2 %v1060_v51  ;;  %1151 = vmatpush.msra.mxu3 %v1051_v2  ;;  %v1034_v51 = vld [vmem:[%s3597_s5 + $0x28] sm:$0xff]  ;;  %v2070_v2 = vld [vmem:[%s3597_s5 + $0x2a0] sm:$0xff] }
 0x110   : > { %1138 = vmatpush.msrb.mxu1 %v2021_v45  ;;  %1116 = vmatpush.msrb.mxu0 %v2018_v48 }
 0x111   : > { %1171 = vmatpush.msra.mxu2 %v1058_v53  ;;  %1152 = vmatpush.msra.mxu3 %v1049_v6  ;;  %v2081_v53 = vld [vmem:[%s3597_s5 + $0x2f8] sm:$0xff]  ;;  %v2066_v6 = vld [vmem:[%s3597_s5 + $0x280] sm:$0xff] }
 0x112   : > { %1139 = vmatpush.msrb.mxu1 %v2019_v49 }
 0x113   : > { %1172 = vmatpush.msra.mxu2 %v1056_v59  ;;  %1153 = vmatpush.msra.mxu3 %v1047_v12  ;;  %v1030_v59 = vld [vmem:[%s3597_s5 + $0x8] sm:$0xff]  ;;  %v2060_v12 = vld [vmem:[%s3597_s5 + $0x250] sm:$0xff] }
 0x115   : > { %1173 = vmatpush.msra.mxu2 %v1054_v63  ;;  %1154 = vmatpush.msra.mxu3 %v1045_v16  ;;  %v2075_v63 = vld [vmem:[%s3597_s5 + $0x2c8] sm:$0xff]  ;;  %v2056_v16 = vld [vmem:[%s3597_s5 + $0x230] sm:$0xff] }
 0x117   : > { %1174 = vmatpush.msra.mxu2 %v1052_v3  ;;  %1155 = vmatpush.msra.mxu3 %v1043_v20  ;;  %v2071_v3 = vld [vmem:[%s3597_s5 + $0x2a8] sm:$0xff]  ;;  %v2052_v20 = vld [vmem:[%s3597_s5 + $0x210] sm:$0xff] }
 0x119   : > { %1175 = vmatpush.msra.mxu2 %v1050_v7  ;;  %1156 = vmatpush.msra.mxu3 %v1041_v24  ;;  %v2067_v7 = vld [vmem:[%s3597_s5 + $0x288] sm:$0xff]  ;;  %v2050_v24 = vld [vmem:[%s3597_s5 + $0x200] sm:$0xff] }
 0x11b   : > { %1176 = vmatpush.msra.mxu2 %v1048_v13  ;;  %1157 = vmatpush.msra.mxu3 %v1039_v38  ;;  %v2061_v13 = vld [vmem:[%s3597_s5 + $0x258] sm:$0xff] }
 0x11d   : > { %1177 = vmatpush.msra.mxu2 %v1046_v17  ;;  %1158 = vmatpush.msra.mxu3 %v1037_v42  ;;  %v2057_v17 = vld [vmem:[%s3597_s5 + $0x238] sm:$0xff] }
 0x11f   : > { %1178 = vmatpush.msra.mxu2 %v1044_v21  ;;  %1159 = vmatpush.msra.mxu3 %v1035_v46  ;;  %v2053_v21 = vld [vmem:[%s3597_s5 + $0x218] sm:$0xff] }
 0x121   : > { %1179 = vmatpush.msra.mxu2 %v1042_v25  ;;  %1160 = vmatpush.msra.mxu3 %v1033_v50  ;;  %v2051_v25 = vld [vmem:[%s3597_s5 + $0x208] sm:$0xff]  ;;  %v1419_v50 = vld [vmem:[%s3600_s8 + $0x78] sm:$0xff] }
 0x123   : > { %1180 = vmatpush.msra.mxu2 %v1040_v39 }
 0x125   : > { %1181 = vmatpush.msra.mxu2 %v1038_v43 }
 0x127   : > { %1182 = vmatpush.msra.mxu2 %v1036_v47 }
 0x129   : > { %1183 = vmatpush.msra.mxu2 %v1034_v51  ;;  %v1418_v51 = vld [vmem:[%s3600_s8 + $0x70] sm:$0xff] }
 0x169   : > { %v2785_v54 = vpop.f32.mrf.mxu2  ;;  %v2787_v55 = vpop.f32.mrf.mxu3 }
 0x171   : > { %v786_v8 = vpop.f32.mrf.mxu2  ;;  %v809_v9 = vpop.f32.mrf.mxu3 }
 0x179   : > { %v838_v26 = vpop.f32.mrf.mxu2  ;;  %v861_v27 = vpop.f32.mrf.mxu3 }
 0x17a   : > { %v867_v28 = vmax.f32 %v2785_v54, %v838_v26  ;;  %v868_v29 = vmax.f32 %v2787_v55, %v861_v27  ;;  %v1031_v54 = vld [vmem:[%s3597_s5 + $0x10] sm:$0xff]  ;;  %v1032_v55 = vld [vmem:[%s3597_s5 + $0x18] sm:$0xff] }
 0x17b   : > { %1161 = vmatpush.msra.mxu3 %v1031_v54  ;;  %1184 = vmatpush.msra.mxu2 %v1032_v55  ;;  %v1281_v54 = vld [vmem:[%s3598_s6] ss:$2 sm:$0x3]  ;;  %v1417_v55 = vld [vmem:[%s3600_s8 + $0x68] sm:$0xff] }
 0x17c   : > { %922 = vmatmul.f32.vlgmr.msra.gmra.mxu0 %v867_v28  ;;  %1986 = vmatmul.msk.f32.vlgmr.msra.gmra.mxu1 %vm899_vm5, %v868_v29 }
 0x17d   : > { %997 = vmatmul.f32.vlgmr.msrb.gmra.mxu2 %v867_v28  ;;  %2016 = vmatmul.msk.f32.vlgmr.msrb.gmra.mxu3 %vm899_vm5, %v868_v29 }
 0x17e   : > { %1231 = vmatpush.msra.mxu0 %v2080_v52  ;;  %1254 = vmatpush.msra.mxu1 %v2081_v53 }
 0x17f   : > { %1162 = vmatpush.msra.mxu3 %v1029_v58  ;;  %1185 = vmatpush.msra.mxu2 %v1030_v59  ;;  %v1416_v58 = vld [vmem:[%s3600_s8 + $0x60] sm:$0xff]  ;;  %v1283_v59 = vperm.slane %v1281_v54, 0 }
 0x180   : > { %1232 = vmatpush.msra.mxu0 %v2078_v56  ;;  %1255 = vmatpush.msra.mxu1 %v2079_v57 }
 0x181   : > { %v841_v32 = vpop.f32.mrf.mxu2  ;;  %v864_v33 = vpop.f32.mrf.mxu3 }
 0x182   : > { %v869_v34 = vmax.f32 %v786_v8, %v841_v32  ;;  %v870_v35 = vmax.f32 %v809_v9, %v864_v33  ;;  %1233 = vmatpush.msra.mxu0 %v2076_v60  ;;  %1256 = vmatpush.msra.mxu1 %v2077_v61  ;;  %v2064_v8 = vld [vmem:[%s3597_s5 + $0x270] sm:$0xff]  ;;  %v2065_v9 = vld [vmem:[%s3597_s5 + $0x278] sm:$0xff] }
 0x184   : > { %925 = vmatmul.f32.gmra.mxu0 %v869_v34  ;;  %1987 = vmatmul.msk.f32.gmra.mxu1 %vm899_vm5, %v870_v35 }
 0x185   : > { %1000 = vmatmul.f32.gmra.mxu2 %v869_v34  ;;  %2017 = vmatmul.msk.f32.gmra.mxu3 %vm899_vm5, %v870_v35 }
 0x186   : > { %1234 = vmatpush.msra.mxu0 %v2074_v62  ;;  %1257 = vmatpush.msra.mxu1 %v2075_v63  ;;  %v1284_v62 = vperm.slane %v1281_v54, 1  ;;  %v2082_v63 = vld [vmem:[%s3598_s6 + $0x1] ss:$2 sm:$0x3] }
 0x187   : > { %v2097_v54 = vld [vmem:[%s3600_s8 + $0x100] sm:$0xff] }
 0x188   : > { %1235 = vmatpush.msra.mxu0 %v2072_v0  ;;  %1258 = vmatpush.msra.mxu1 %v2073_v1  ;;  %v1415_v0 = vld [vmem:[%s3600_s8 + $0x58] sm:$0xff] }
 0x189   : > { %v1431_v1 = vld [vmem:[%s3600_s8 + $0xd8] sm:$0xff] }
 0x18a   : > { %1236 = vmatpush.msra.mxu0 %v2070_v2  ;;  %1259 = vmatpush.msra.mxu1 %v2071_v3 }
 0x18c   : > { %1237 = vmatpush.msra.mxu0 %v2068_v4  ;;  %1260 = vmatpush.msra.mxu1 %v2069_v5 }
 0x18e   : > { %1238 = vmatpush.msra.mxu0 %v2066_v6  ;;  %1261 = vmatpush.msra.mxu1 %v2067_v7  ;;  %v1414_v6 = vld [vmem:[%s3600_s8 + $0x50] sm:$0xff] }
 0x18f   : > { %v1430_v7 = vld [vmem:[%s3600_s8 + $0xd0] sm:$0xff] }
 0x190   : > { %1239 = vmatpush.msra.mxu0 %v2064_v8  ;;  %1262 = vmatpush.msra.mxu1 %v2065_v9  ;;  %v1294_v9 = vperm.slane %v2082_v63, 0 }
 0x192   : > { %1240 = vmatpush.msra.mxu0 %v2062_v10  ;;  %1263 = vmatpush.msra.mxu1 %v2063_v11  ;;  %v1295_v11 = vperm.slane %v2082_v63, 1  ;;  %v2111_v63 = vld [vmem:[%s3600_s8 + $0x170] sm:$0xff] }
 0x194   : > { %1241 = vmatpush.msra.mxu0 %v2060_v12  ;;  %1264 = vmatpush.msra.mxu1 %v2061_v13 }
 0x196   : > { %1242 = vmatpush.msra.mxu0 %v2058_v14  ;;  %1265 = vmatpush.msra.mxu1 %v2059_v15 }
 0x198   : > { %1243 = vmatpush.msra.mxu0 %v2056_v16  ;;  %1266 = vmatpush.msra.mxu1 %v2057_v17  ;;  %v1413_v16 = vld [vmem:[%s3600_s8 + $0x48] sm:$0xff] }
 0x199   : > { %v1429_v17 = vld [vmem:[%s3600_s8 + $0xc8] sm:$0xff] }
 0x19a   : > { %1244 = vmatpush.msra.mxu0 %v2054_v18  ;;  %1267 = vmatpush.msra.mxu1 %v2055_v19 }
 0x19c   : > { %1245 = vmatpush.msra.mxu0 %v2052_v20  ;;  %1268 = vmatpush.msra.mxu1 %v2053_v21 }
 0x19e   : > { %1246 = vmatpush.msra.mxu0 %v2050_v24  ;;  %1269 = vmatpush.msra.mxu1 %v2051_v25 }
 0x1f9   : > { %v923_v22 = vpop.f32.mrf.mxu0  ;;  %v946_v23 = vpop.f32.mrf.mxu1 }
 0x1fa   : > { %v947_v28 = vadd.f32 %v946_v23, %v923_v22 }
 0x200   : > { %v998_v26 = vpop.f32.mrf.mxu2  ;;  %v1021_v27 = vpop.f32.mrf.mxu3 }
 0x201   : > { %v1022_v29 = vadd.f32 %v1021_v27, %v998_v26  ;;  %v926_v31 = vpop.f32.mrf.mxu0  ;;  %v949_v32 = vpop.f32.mrf.mxu1 }
 0x202   : > { %v950_v35 = vadd.f32 %v949_v32, %v926_v31  ;;  %v2107_v31 = vld [vmem:[%s3600_s8 + $0x150] sm:$0xff] }
 0x203   : > { %v1027_v30 = vmax.f32 %v947_v28, %v1022_v29  ;;  %v1306_v28 = vld [vmem:[%s3599_s7] sm:$0x7f]  ;;  %v2108_v29 = vld [vmem:[%s3600_s8 + $0x158] sm:$0xff]  ;;  %v2119_v32 = vld [vmem:[%s3600_s8 + $0x1b0] sm:$0xff] }
 0x205   : > { %1163 = vmatmul.f32.vlgmr.msra.gmra.mxu3 %v1027_v30  ;;  %1186 = vmatmul.f32.vlgmr.msra.gmra.mxu2 %v1027_v30  ;;  %v1096_v38 = vrot.slane %v1027_v30, 1  ;;  %v1226_v42 = vrot.slane %v1027_v30, 2  ;;  %v2120_v30 = vld [vmem:[%s3600_s8 + $0x1b8] sm:$0xff] }
 0x208   : > { %v1001_v33 = vpop.f32.mrf.mxu2  ;;  %v1024_v34 = vpop.f32.mrf.mxu3 }
 0x209   : > { %v1025_v36 = vadd.f32 %v1024_v34, %v1001_v33  ;;  %v2087_v33 = vld [vmem:[%s3599_s7 + $0x8] sm:$0x7f] }
 0x20a   : > { %v2106_v34 = vld [vmem:[%s3600_s8 + $0x148] sm:$0xff] }
 0x20b   : > { %v1028_v37 = vmax.f32 %v950_v35, %v1025_v36  ;;  %v2118_v35 = vld [vmem:[%s3600_s8 + $0x1a8] sm:$0xff]  ;;  %v2105_v36 = vld [vmem:[%s3600_s8 + $0x140] sm:$0xff] }
 0x20d   : > { %1166 = vmatmul.f32.gmra.mxu3 %v1028_v37  ;;  %1189 = vmatmul.f32.gmra.mxu2 %v1028_v37  ;;  %v1097_v39 = vrot.slane %v1028_v37, 1  ;;  %v1227_v41 = vrot.slane %v1028_v37, 2  ;;  %v2117_v37 = vld [vmem:[%s3600_s8 + $0x1a0] sm:$0xff] }
 0x20f   : > { %v1098_v40 = vsel %vm463_vm2, %v1096_v38, %v1097_v39  ;;  %v1228_v43 = vsel %vm480_vm0, %v1226_v42, %v1227_v41  ;;  %v2104_v38 = vld [vmem:[%s3600_s8 + $0x138] sm:$0xff]  ;;  %v2102_v42 = vld [vmem:[%s3600_s8 + $0x128] sm:$0xff] }
 0x210   : > { %1117 = vmatmul.f32.vlgmr.msrb.gmra.mxu0 %v1098_v40  ;;  %1140 = vmatmul.f32.vlgmr.msrb.gmra.mxu1 %v1098_v40  ;;  %v2103_v40 = vld [vmem:[%s3600_s8 + $0x130] sm:$0xff] }
 0x211   : > { %1435 = vmatpush.msrb.mxu0 %v1419_v50  ;;  %1459 = vmatpush.msrb.mxu1 %v1431_v1  ;;  %v1410_v50 = vld [vmem:[%s3600_s8 + $0x30] sm:$0xff]  ;;  %v1423_v1 = vld [vmem:[%s3600_s8 + $0x98] sm:$0xff] }
 0x213   : > { %1436 = vmatpush.msrb.mxu0 %v1418_v51  ;;  %1460 = vmatpush.msrb.mxu1 %v1430_v7  ;;  %v1426_v51 = vld [vmem:[%s3600_s8 + $0xb0] sm:$0xff]  ;;  %v2093_v7 = vld [vmem:[%s3600_s8 + $0xe0] sm:$0xff] }
 0x215   : > { %1437 = vmatpush.msrb.mxu0 %v1417_v55  ;;  %1461 = vmatpush.msrb.mxu1 %v1429_v17  ;;  %v2113_v55 = vld [vmem:[%s3600_s8 + $0x180] sm:$0xff]  ;;  %v2149_v17 = vld [vmem:[%s3601_s9 + $0x138] sm:$0xff] }
 0x217   : > { %1438 = vmatpush.msrb.mxu0 %v1416_v58  ;;  %v1409_v58 = vld [vmem:[%s3600_s8 + $0x28] sm:$0xff] }
 0x218   : > { %1120 = vmatmul.f32.gmra.mxu0 %v1097_v39  ;;  %1143 = vmatmul.f32.gmra.mxu1 %v1097_v39  ;;  %v2116_v39 = vld [vmem:[%s3600_s8 + $0x198] sm:$0xff] }
 0x219   : > { %1439 = vmatpush.msrb.mxu0 %v1415_v0  ;;  %v1407_v0 = vld [vmem:[%s3600_s8 + $0x18] sm:$0xff] }
 0x21b   : > { %1440 = vmatpush.msrb.mxu0 %v1414_v6  ;;  %v1405_v6 = vld [vmem:[%s3600_s8 + $0x8] sm:$0xff] }
 0x21d   : > { %1441 = vmatpush.msrb.mxu0 %v1413_v16  ;;  %v2134_v16 = vld [vmem:[%s3601_s9 + $0xd0] sm:$0xff] }
 0x220   : > { %1247 = vmatmul.f32.vlgmr.msra.gmra.mxu0 %v1228_v43  ;;  %1270 = vmatmul.f32.vlgmr.msra.gmra.mxu1 %v1228_v43  ;;  %v2101_v43 = vld [vmem:[%s3600_s8 + $0x120] sm:$0xff] }
 0x228   : > { %1250 = vmatmul.f32.gmra.mxu0 %v1227_v41  ;;  %1273 = vmatmul.f32.gmra.mxu1 %v1227_v41  ;;  %v2115_v41 = vld [vmem:[%s3600_s8 + $0x190] sm:$0xff] }
 0x288   : > { %v1164_v48 = vpop.f32.mrf.mxu3  ;;  %v1187_v49 = vpop.f32.mrf.mxu2 }
 0x28d   : > { %v1118_v44 = vpop.f32.mrf.mxu0  ;;  %v1141_v45 = vpop.f32.mrf.mxu1 }
 0x28e   : > { %v1165_v56 = vadd.f32 %v1164_v48, %v1118_v44  ;;  %v1188_v57 = vadd.f32 %v1187_v49, %v1141_v45  ;;  %v2100_v44 = vld [vmem:[%s3600_s8 + $0x118] sm:$0xff]  ;;  %v2099_v45 = vld [vmem:[%s3600_s8 + $0x110] sm:$0xff] }
 0x28f   : > { %v1411_v48 = vld [vmem:[%s3600_s8 + $0x38] sm:$0xff] }
 0x290   : > { %v1167_v2 = vpop.f32.mrf.mxu3  ;;  %v1190_v3 = vpop.f32.mrf.mxu2  ;;  %v1427_v49 = vld [vmem:[%s3600_s8 + $0xb8] sm:$0xff] }
 0x295   : > { %v1121_v46 = vpop.f32.mrf.mxu0  ;;  %v1144_v47 = vpop.f32.mrf.mxu1 }
 0x296   : > { %v1168_v4 = vadd.f32 %v1167_v2, %v1121_v46  ;;  %v1191_v5 = vadd.f32 %v1190_v3, %v1144_v47  ;;  %v1412_v46 = vld [vmem:[%s3600_s8 + $0x40] sm:$0xff]  ;;  %v1406_v2 = vld [vmem:[%s3600_s8 + $0x10] sm:$0xff] }
 0x297   : > { %v1428_v47 = vld [vmem:[%s3600_s8 + $0xc0] sm:$0xff]  ;;  %1442 = vmatpush.msrb.mxu0 %v1412_v46  ;;  %v1422_v3 = vld [vmem:[%s3600_s8 + $0x90] sm:$0xff]  ;;  %v2141_v46 = vld [vmem:[%s3601_s9 + $0xf8] sm:$0xff] }
 0x298   : > { %1462 = vmatpush.msrb.mxu1 %v1428_v47  ;;  %v1549_v47 = vld [vmem:[%s3601_s9 + $0x20] sm:$0xff] }
 0x299   : > { %1443 = vmatpush.msrb.mxu0 %v1411_v48  ;;  %v2161_v48 = vld [vmem:[%s3601_s9 + $0x190] sm:$0xff] }
 0x29a   : > { %1463 = vmatpush.msrb.mxu1 %v1427_v49 }
 0x29b   : > { %1444 = vmatpush.msrb.mxu0 %v1410_v50 }
 0x29c   : > { %1464 = vmatpush.msrb.mxu1 %v1426_v51  ;;  %v2125_v51 = vld [vmem:[%s3601_s9 + $0x88] sm:$0xff] }
 0x29d   : > { %v1248_v52 = vpop.f32.mrf.mxu0  ;;  %v1271_v53 = vpop.f32.mrf.mxu1  ;;  %1445 = vmatpush.msrb.mxu0 %v1409_v58  ;;  %v2159_v58 = vld [vmem:[%s3601_s9 + $0x180] sm:$0xff] }
 0x29e   : > { %v1277_v60 = vadd.f32 %v1248_v52, %v1165_v56  ;;  %v1278_v61 = vadd.f32 %v1271_v53, %v1188_v57  ;;  %v2098_v52 = vld [vmem:[%s3600_s8 + $0x108] sm:$0xff]  ;;  %v2096_v56 = vld [vmem:[%s3600_s8 + $0xf8] sm:$0xff] }
 0x29f   : > { %v2114_v53 = vld [vmem:[%s3600_s8 + $0x188] sm:$0xff]  ;;  %v2112_v57 = vld [vmem:[%s3600_s8 + $0x178] sm:$0xff] }
 0x2a0   : > { %v1287_v12 = vmul.f32 %v1283_v59, %v1277_v60  ;;  %v1288_v13 = vmul.f32 %v1284_v62, %v1278_v61  ;;  %v1408_v60 = vld [vmem:[%s3600_s8 + $0x20] sm:$0xff] }
 0x2a1   : > { %v1424_v61 = vld [vmem:[%s3600_s8 + $0xa0] sm:$0xff]  ;;  %1446 = vmatpush.msrb.mxu0 %v1408_v60 }
 0x2a2   : > { %v1298_v22 = vadd.f32 %v1294_v9, %v1287_v12  ;;  %v1299_v23 = vadd.f32 %v1295_v11, %v1288_v13  ;;  %v2151_v12 = vld [vmem:[%s3601_s9 + $0x148] sm:$0xff]  ;;  %v2135_v13 = vld [vmem:[%s3601_s9 + $0xd8] sm:$0xff]  ;;  %v2138_v60 = vld [vmem:[%s3601_s9 + $0xe0] sm:$0xff] }
 0x2a3   : > { %1447 = vmatpush.msrb.mxu0 %v1407_v0  ;;  %v1545_v0 = vld [vmem:[%s3601_s9] sm:$0xff] }
 0x2a4   : > { %v1302_v26 = vmax.f32 %v1298_v22, 0.0  ;;  %v1303_v27 = vmax.f32 %v1299_v23, 0.0  ;;  %v2132_v22 = vld [vmem:[%s3601_s9 + $0xc0] sm:$0xff]  ;;  %v2147_v23 = vld [vmem:[%s3601_s9 + $0x128] sm:$0xff] }
 0x2a5   : > { %v1251_v8 = vpop.f32.mrf.mxu0  ;;  %v1274_v10 = vpop.f32.mrf.mxu1  ;;  %1448 = vmatpush.msrb.mxu0 %v1406_v2 }
 0x2a6   : > { %v1279_v14 = vadd.f32 %v1251_v8, %v1168_v4  ;;  %v1280_v15 = vadd.f32 %v1274_v10, %v1191_v5  ;;  %v2094_v4 = vld [vmem:[%s3600_s8 + $0xe8] sm:$0xff]  ;;  %v2109_v8 = vld [vmem:[%s3600_s8 + $0x160] sm:$0xff] }
 0x2a7   : > { %v2110_v5 = vld [vmem:[%s3600_s8 + $0x168] sm:$0xff]  ;;  %v1404_v10 = vld [vmem:[%s3600_s8] sm:$0xff]  ;;  %1449 = vmatpush.msrb.mxu0 %v1405_v6 }
 0x2a8   : > { %v1289_v18 = vmul.f32 %v1283_v59, %v1279_v14  ;;  %v1290_v19 = vmul.f32 %v1284_v62, %v1280_v15  ;;  %v1425_v59 = vld [vmem:[%s3600_s8 + $0xa8] sm:$0xff]  ;;  %v2095_v62 = vld [vmem:[%s3600_s8 + $0xf0] sm:$0xff]  ;;  %v2150_v14 = vld [vmem:[%s3601_s9 + $0x140] sm:$0xff] }
 0x2a9   : > { %1465 = vmatpush.msrb.mxu1 %v1425_v59  ;;  %v1558_v15 = vld [vmem:[%s3601_s9 + $0x68] sm:$0xff]  ;;  %1450 = vmatpush.msrb.mxu0 %v1404_v10  ;;  %v2123_v59 = vld [vmem:[%s3601_s9 + $0x78] sm:$0xff]  ;;  %v2195_v10 = vld [vmem:[%s3601_s9 + $0x290] sm:$0xff] }
 0x2aa   : > { %v1300_v20 = vadd.f32 %v1294_v9, %v1289_v18  ;;  %v1301_v21 = vadd.f32 %v1295_v11, %v1290_v19  ;;  %v1421_v9 = vld [vmem:[%s3600_s8 + $0x88] sm:$0xff]  ;;  %v1420_v11 = vld [vmem:[%s3600_s8 + $0x80] sm:$0xff] }
 0x2ab   : > { %1466 = vmatpush.msrb.mxu1 %v1424_v61  ;;  %v1557_v18 = vld [vmem:[%s3601_s9 + $0x60] sm:$0xff]  ;;  %1603 = vmatpush.msra.mxu0 %v1558_v15  ;;  %v2133_v19 = vld [vmem:[%s3601_s9 + $0xc8] sm:$0xff]  ;;  %v2178_v15 = vld [vmem:[%s3601_s9 + $0x210] sm:$0xff] }
 0x2ac   : > { %v1304_v24 = vmax.f32 %v1300_v20, 0.0  ;;  %v1305_v25 = vmax.f32 %v1301_v21, 0.0  ;;  %v2148_v20 = vld [vmem:[%s3601_s9 + $0x130] sm:$0xff]  ;;  %v1556_v21 = vld [vmem:[%s3601_s9 + $0x58] sm:$0xff]  ;;  %v1546_v61 = vld [vmem:[%s3601_s9 + $0x8] sm:$0xff] }
 0x2ad   : > { %1467 = vmatpush.msrb.mxu1 %v1423_v1  ;;  %1604 = vmatpush.msra.mxu0 %v1557_v18  ;;  %v2181_v6 = vld [vmem:[%s3601_s9 + $0x228] sm:$0xff] }
 0x2ae   : > { %2083 = vmatpush.msk.msrb.mxu3 %vm480_vm0, %v1304_v24  ;;  %2085 = vmatpush.msk.msrb.mxu2 %vm480_vm0, %v1305_v25  ;;  %v2177_v18 = vld [vmem:[%s3601_s9 + $0x208] sm:$0xff] }
 0x2af   : > { %1468 = vmatpush.msrb.mxu1 %v1422_v3  ;;  %1605 = vmatpush.msra.mxu0 %v1556_v21  ;;  %v2191_v21 = vld [vmem:[%s3601_s9 + $0x270] sm:$0xff] }
 0x2b0   : > { %1332 = vmatpush.msrb.mxu3 %v1302_v26  ;;  %1352 = vmatpush.msrb.mxu2 %v1303_v27 }
 0x2b1   : > { %2084 = vmatmul.msk.f32.vlgmr.msrb.gmra.mxu3 %vm1307_vm6, %v1306_v28  ;;  %2086 = vmatmul.msk.f32.vlgmr.msrb.gmra.mxu2 %vm1307_vm6, %v1306_v28  ;;  %v2130_v28 = vld [vmem:[%s3601_s9 + $0xb0] sm:$0xff] }
 0x2b2   : > { %2088 = vmatpush.msk.msra.mxu3 %vm480_vm0, %v1304_v24  ;;  %2090 = vmatpush.msk.msra.mxu2 %vm480_vm0, %v1305_v25  ;;  %v1555_v24 = vld [vmem:[%s3601_s9 + $0x50] sm:$0xff]  ;;  %v2131_v25 = vld [vmem:[%s3601_s9 + $0xb8] sm:$0xff] }
 0x2b3   : > { %1469 = vmatpush.msrb.mxu1 %v1421_v9  ;;  %1606 = vmatpush.msra.mxu0 %v1555_v24  ;;  %v2180_v9 = vld [vmem:[%s3601_s9 + $0x220] sm:$0xff]  ;;  %v2190_v24 = vld [vmem:[%s3601_s9 + $0x268] sm:$0xff] }
 0x2b4   : > { %1377 = vmatpush.msra.mxu3 %v1302_v26  ;;  %1397 = vmatpush.msra.mxu2 %v1303_v27  ;;  %v2146_v26 = vld [vmem:[%s3601_s9 + $0x120] sm:$0xff]  ;;  %v1554_v27 = vld [vmem:[%s3601_s9 + $0x48] sm:$0xff] }
 0x2b5   : > { %1470 = vmatpush.msrb.mxu1 %v1420_v11  ;;  %1607 = vmatpush.msra.mxu0 %v1554_v27  ;;  %v2209_v11 = vld [vmem:[%s3601_s9 + $0x2f8] sm:$0xff] }
 0x2b6   : > { %1504 = vmatpush.msrb.mxu3 %v2108_v29  ;;  %1528 = vmatpush.msrb.mxu2 %v2120_v30  ;;  %v2145_v29 = vld [vmem:[%s3601_s9 + $0x118] sm:$0xff] }
 0x2b7   : > { %1581 = vmatpush.msra.mxu1 %v2135_v13  ;;  %v2166_v30 = vld [vmem:[%s3601_s9 + $0x1b8] sm:$0xff]  ;;  %v2194_v13 = vld [vmem:[%s3601_s9 + $0x288] sm:$0xff] }
 0x2b8   : > { %1505 = vmatpush.msrb.mxu3 %v2107_v31  ;;  %1529 = vmatpush.msrb.mxu2 %v2119_v32  ;;  %v1553_v31 = vld [vmem:[%s3601_s9 + $0x40] sm:$0xff]  ;;  %v2165_v32 = vld [vmem:[%s3601_s9 + $0x1b0] sm:$0xff]  ;;  %v2175_v27 = vld [vmem:[%s3601_s9 + $0x1f8] sm:$0xff] }
 0x2b9   : > { %2089 = vmatmul.msk.f32.vlgmr.msra.gmra.mxu3 %vm1307_vm6, %v2087_v33  ;;  %2091 = vmatmul.msk.f32.vlgmr.msra.gmra.mxu2 %vm1307_vm6, %v2087_v33  ;;  %v2129_v33 = vld [vmem:[%s3601_s9 + $0xa8] sm:$0xff] }
 0x2ba   : > { %1506 = vmatpush.msrb.mxu3 %v2106_v34  ;;  %1530 = vmatpush.msrb.mxu2 %v2118_v35  ;;  %v2144_v34 = vld [vmem:[%s3601_s9 + $0x110] sm:$0xff]  ;;  %v1552_v35 = vld [vmem:[%s3601_s9 + $0x38] sm:$0xff] }
 0x2bb   : > { %1582 = vmatpush.msra.mxu1 %v2134_v16  ;;  %1608 = vmatpush.msra.mxu0 %v1553_v31  ;;  %v2193_v16 = vld [vmem:[%s3601_s9 + $0x280] sm:$0xff]  ;;  %v2174_v31 = vld [vmem:[%s3601_s9 + $0x1f0] sm:$0xff] }
 0x2bc   : > { %1507 = vmatpush.msrb.mxu3 %v2105_v36  ;;  %1531 = vmatpush.msrb.mxu2 %v2117_v37  ;;  %v2164_v36 = vld [vmem:[%s3601_s9 + $0x1a8] sm:$0xff]  ;;  %v2128_v37 = vld [vmem:[%s3601_s9 + $0xa0] sm:$0xff] }
 0x2bd   : > { %1583 = vmatpush.msra.mxu1 %v2133_v19  ;;  %1609 = vmatpush.msra.mxu0 %v1552_v35  ;;  %v2192_v19 = vld [vmem:[%s3601_s9 + $0x278] sm:$0xff]  ;;  %v2202_v35 = vld [vmem:[%s3601_s9 + $0x2c0] sm:$0xff] }
 0x2be   : > { %1508 = vmatpush.msrb.mxu3 %v2104_v38  ;;  %1532 = vmatpush.msrb.mxu2 %v2116_v39  ;;  %v2143_v38 = vld [vmem:[%s3601_s9 + $0x108] sm:$0xff]  ;;  %v1551_v39 = vld [vmem:[%s3601_s9 + $0x30] sm:$0xff] }
 0x2bf   : > { %1584 = vmatpush.msra.mxu1 %v2132_v22  ;;  %1610 = vmatpush.msra.mxu0 %v1551_v39  ;;  %v2157_v22 = vld [vmem:[%s3601_s9 + $0x170] sm:$0xff]  ;;  %v2172_v39 = vld [vmem:[%s3601_s9 + $0x1e0] sm:$0xff] }
 0x2c0   : > { %1509 = vmatpush.msrb.mxu3 %v2103_v40  ;;  %1533 = vmatpush.msrb.mxu2 %v2115_v41  ;;  %v2163_v40 = vld [vmem:[%s3601_s9 + $0x1a0] sm:$0xff]  ;;  %v2127_v41 = vld [vmem:[%s3601_s9 + $0x98] sm:$0xff] }
 0x2c1   : > { %1585 = vmatpush.msra.mxu1 %v2131_v25  ;;  %v2205_v25 = vld [vmem:[%s3601_s9 + $0x2d8] sm:$0xff] }
 0x2c2   : > { %1510 = vmatpush.msrb.mxu3 %v2102_v42  ;;  %1534 = vmatpush.msrb.mxu2 %v2114_v53  ;;  %v2142_v42 = vld [vmem:[%s3601_s9 + $0x100] sm:$0xff]  ;;  %v1548_v53 = vld [vmem:[%s3601_s9 + $0x18] sm:$0xff] }
 0x2c3   : > { %1586 = vmatpush.msra.mxu1 %v2130_v28  ;;  %v2189_v28 = vld [vmem:[%s3601_s9 + $0x260] sm:$0xff] }
 0x2c4   : > { %1511 = vmatpush.msrb.mxu3 %v2101_v43  ;;  %1535 = vmatpush.msrb.mxu2 %v2113_v55  ;;  %v1550_v43 = vld [vmem:[%s3601_s9 + $0x28] sm:$0xff]  ;;  %v2124_v55 = vld [vmem:[%s3601_s9 + $0x80] sm:$0xff] }
 0x2c5   : > { %1587 = vmatpush.msra.mxu1 %v2129_v33  ;;  %1611 = vmatpush.msra.mxu0 %v1550_v43  ;;  %v2154_v33 = vld [vmem:[%s3601_s9 + $0x158] sm:$0xff]  ;;  %v2200_v43 = vld [vmem:[%s3601_s9 + $0x2b0] sm:$0xff] }
 0x2c6   : > { %1512 = vmatpush.msrb.mxu3 %v2100_v44  ;;  %1536 = vmatpush.msrb.mxu2 %v2112_v57  ;;  %v2162_v44 = vld [vmem:[%s3601_s9 + $0x198] sm:$0xff]  ;;  %v1547_v57 = vld [vmem:[%s3601_s9 + $0x10] sm:$0xff] }
 0x2c7   : > { %1588 = vmatpush.msra.mxu1 %v2128_v37  ;;  %1612 = vmatpush.msra.mxu0 %v1549_v47  ;;  %v2187_v37 = vld [vmem:[%s3601_s9 + $0x250] sm:$0xff]  ;;  %v2169_v47 = vld [vmem:[%s3601_s9 + $0x1c8] sm:$0xff] }
 0x2c8   : > { %1513 = vmatpush.msrb.mxu3 %v2099_v45  ;;  %1537 = vmatpush.msrb.mxu2 %v2111_v63  ;;  %v2126_v45 = vld [vmem:[%s3601_s9 + $0x90] sm:$0xff] }
 0x2c9   : > { %1589 = vmatpush.msra.mxu1 %v2127_v41  ;;  %1613 = vmatpush.msra.mxu0 %v1548_v53  ;;  %v2122_v63 = vld [vmem:[%s3601_s9 + $0x70] sm:$0xff]  ;;  %v2186_v41 = vld [vmem:[%s3601_s9 + $0x248] sm:$0xff] }
 0x2ca   : > { %1514 = vmatpush.msrb.mxu3 %v2098_v52  ;;  %1538 = vmatpush.msrb.mxu2 %v2110_v5  ;;  %v2140_v52 = vld [vmem:[%s3601_s9 + $0xf0] sm:$0xff]  ;;  %v2211_v5 = vld [vmem:[%s3601_s9 + $0x308] sm:$0xff] }
 0x2cb   : > { %1590 = vmatpush.msra.mxu1 %v2126_v45  ;;  %1614 = vmatpush.msra.mxu0 %v1547_v57  ;;  %v2185_v45 = vld [vmem:[%s3601_s9 + $0x240] sm:$0xff] }
 0x2cc   : > { %1515 = vmatpush.msrb.mxu3 %v2097_v54  ;;  %1539 = vmatpush.msrb.mxu2 %v2109_v8  ;;  %v2160_v54 = vld [vmem:[%s3601_s9 + $0x188] sm:$0xff]  ;;  %v2210_v8 = vld [vmem:[%s3601_s9 + $0x300] sm:$0xff] }
 0x2cd   : > { %1591 = vmatpush.msra.mxu1 %v2125_v51  ;;  %1615 = vmatpush.msra.mxu0 %v1546_v61  ;;  %v2168_v51 = vld [vmem:[%s3601_s9 + $0x1c0] sm:$0xff] }
 0x2ce   : > { %1516 = vmatpush.msrb.mxu3 %v2096_v56  ;;  %1641 = vmatpush.msra.mxu2 %v2151_v12  ;;  %v2139_v56 = vld [vmem:[%s3601_s9 + $0xe8] sm:$0xff]  ;;  %v2179_v12 = vld [vmem:[%s3601_s9 + $0x218] sm:$0xff] }
 0x2cf   : > { %1592 = vmatpush.msra.mxu1 %v2124_v55  ;;  %1616 = vmatpush.msra.mxu0 %v1545_v0 }
 0x2d0   : > { %1517 = vmatpush.msrb.mxu3 %v2095_v62  ;;  %1642 = vmatpush.msra.mxu2 %v2150_v14  ;;  %v2158_v62 = vld [vmem:[%s3601_s9 + $0x178] sm:$0xff]  ;;  %v2208_v14 = vld [vmem:[%s3601_s9 + $0x2f0] sm:$0xff] }
 0x2d1   : > { %1593 = vmatpush.msra.mxu1 %v2123_v59 }
 0x2d2   : > { %1518 = vmatpush.msrb.mxu3 %v2094_v4  ;;  %1643 = vmatpush.msra.mxu2 %v2149_v17  ;;  %v2207_v17 = vld [vmem:[%s3601_s9 + $0x2e8] sm:$0xff] }
 0x2d3   : > { %1594 = vmatpush.msra.mxu1 %v2122_v63 }
 0x2d4   : > { %1519 = vmatpush.msrb.mxu3 %v2093_v7  ;;  %1644 = vmatpush.msra.mxu2 %v2148_v20  ;;  %v2196_v7 = vld [vmem:[%s3601_s9 + $0x298] sm:$0xff]  ;;  %v2206_v20 = vld [vmem:[%s3601_s9 + $0x2e0] sm:$0xff] }
 0x2d6   : > { %1645 = vmatpush.msra.mxu2 %v2147_v23  ;;  %1680 = vmatpush.msra.mxu3 %v2166_v30  ;;  %v2176_v23 = vld [vmem:[%s3601_s9 + $0x200] sm:$0xff] }
 0x2d7   : > { %v2155_v30 = vld [vmem:[%s3601_s9 + $0x160] sm:$0xff] }
 0x2d8   : > { %1646 = vmatpush.msra.mxu2 %v2146_v26  ;;  %1681 = vmatpush.msra.mxu3 %v2165_v32  ;;  %v2156_v26 = vld [vmem:[%s3601_s9 + $0x168] sm:$0xff] }
 0x2d9   : > { %v2203_v32 = vld [vmem:[%s3601_s9 + $0x2c8] sm:$0xff] }
 0x2da   : > { %1647 = vmatpush.msra.mxu2 %v2145_v29  ;;  %1682 = vmatpush.msra.mxu3 %v2164_v36  ;;  %v2204_v29 = vld [vmem:[%s3601_s9 + $0x2d0] sm:$0xff]  ;;  %v2188_v36 = vld [vmem:[%s3601_s9 + $0x258] sm:$0xff] }
 0x2dc   : > { %1648 = vmatpush.msra.mxu2 %v2144_v34  ;;  %1683 = vmatpush.msra.mxu3 %v2163_v40  ;;  %v2173_v34 = vld [vmem:[%s3601_s9 + $0x1e8] sm:$0xff]  ;;  %v2201_v40 = vld [vmem:[%s3601_s9 + $0x2b8] sm:$0xff] }
 0x2de   : > { %1649 = vmatpush.msra.mxu2 %v2143_v38  ;;  %1684 = vmatpush.msra.mxu3 %v2162_v44  ;;  %v2153_v38 = vld [vmem:[%s3601_s9 + $0x150] sm:$0xff] }
 0x2df   : > { %v2170_v44 = vld [vmem:[%s3601_s9 + $0x1d0] sm:$0xff] }
 0x2e0   : > { %1650 = vmatpush.msra.mxu2 %v2142_v42  ;;  %1685 = vmatpush.msra.mxu3 %v2161_v48  ;;  %v2171_v42 = vld [vmem:[%s3601_s9 + $0x1d8] sm:$0xff] }
 0x2e1   : > { %v2184_v48 = vld [vmem:[%s3601_s9 + $0x238] sm:$0xff] }
 0x2e2   : > { %1651 = vmatpush.msra.mxu2 %v2141_v46  ;;  %1686 = vmatpush.msra.mxu3 %v2160_v54  ;;  %v2199_v46 = vld [vmem:[%s3601_s9 + $0x2a8] sm:$0xff] }
 0x2e4   : > { %1652 = vmatpush.msra.mxu2 %v2140_v52  ;;  %1687 = vmatpush.msra.mxu3 %v2159_v58 }
 0x2e6   : > { %1653 = vmatpush.msra.mxu2 %v2139_v56  ;;  %1688 = vmatpush.msra.mxu3 %v2158_v62 }
 0x2e8   : > { %1654 = vmatpush.msra.mxu2 %v2138_v60  ;;  %1689 = vmatpush.msra.mxu3 %v2157_v22 }
 0x2ea   : > { %1690 = vmatpush.msra.mxu3 %v2156_v26 }
 0x2ec   : > { %1691 = vmatpush.msra.mxu3 %v2155_v30 }
 0x2ee   : > { %1692 = vmatpush.msra.mxu3 %v2154_v33 }
 0x2f0   : > { %1693 = vmatpush.msra.mxu3 %v2153_v38 }
 0x334   : > { %v1334_v49 = vpop.f32.mrf.mxu3  ;;  %v1354_v50 = vpop.f32.mrf.mxu2 }
 0x33c   : > { %v1379_v1 = vpop.f32.mrf.mxu3  ;;  %v1399_v2 = vpop.f32.mrf.mxu2 }
 0x33d   : > { %v1402_v3 = vmax.f32 %v1334_v49, %v1379_v1  ;;  %v1403_v4 = vmax.f32 %v1354_v50, %v1399_v2  ;;  %v2198_v49 = vld [vmem:[%s3601_s9 + $0x2a0] sm:$0xff]  ;;  %v2183_v50 = vld [vmem:[%s3601_s9 + $0x230] sm:$0xff]  ;;  %v1824_v1 = vld [vmem:[%s3603_s11 + $0x18] sm:$0xff] }
 0x33e   : > { %v1823_v2 = vld [vmem:[%s3603_s11 + $0x10] sm:$0xff] }
 0x33f   : > { %1520 = vmatmul.f32.vlgmr.msrb.gmra.mxu3 %v1402_v3  ;;  %2121 = vmatmul.msk.f32.vlgmr.msrb.gmra.mxu2 %vm899_vm5, %v1403_v4 }
 0x340   : > { %1451 = vmatmul.f32.vlgmr.msrb.gmra.mxu0 %v1402_v3  ;;  %2092 = vmatmul.msk.f32.vlgmr.msrb.gmra.mxu1 %vm899_vm5, %v1403_v4  ;;  %v1822_v3 = vld [vmem:[%s3603_s11 + $0x8] sm:$0xff]  ;;  %v1821_v4 = vld [vmem:[%s3603_s11] sm:$0xff] }
 0x341   : > { %1797 = vmatpush.msrb.mxu2 %v2211_v5  ;;  %1719 = vmatpush.msrb.mxu1 %v2181_v6 }
 0x342   : > { %1758 = vmatpush.msrb.mxu0 %v2196_v7  ;;  %1842 = vmatpush.msrb.mxu3 %v1824_v1 }
 0x343   : > { %1798 = vmatpush.msrb.mxu2 %v2210_v8  ;;  %1720 = vmatpush.msrb.mxu1 %v2180_v9 }
 0x344   : > { %1759 = vmatpush.msrb.mxu0 %v2195_v10  ;;  %1843 = vmatpush.msrb.mxu3 %v1823_v2 }
 0x345   : > { %1799 = vmatpush.msrb.mxu2 %v2209_v11  ;;  %1721 = vmatpush.msrb.mxu1 %v2179_v12 }
 0x346   : > { %1760 = vmatpush.msrb.mxu0 %v2194_v13  ;;  %1844 = vmatpush.msrb.mxu3 %v1822_v3 }
 0x347   : > { %1800 = vmatpush.msrb.mxu2 %v2208_v14  ;;  %1722 = vmatpush.msrb.mxu1 %v2178_v15 }
 0x348   : > { %1761 = vmatpush.msrb.mxu0 %v2193_v16  ;;  %1845 = vmatpush.msrb.mxu3 %v1821_v4 }
 0x349   : > { %1801 = vmatpush.msrb.mxu2 %v2207_v17  ;;  %1723 = vmatpush.msrb.mxu1 %v2177_v18  ;;  %v1816_v17 = vld [vmem:[%s3602_s10] sm:$0x1] }
 0x34a   : > { %1762 = vmatpush.msrb.mxu0 %v2192_v19  ;;  %v1818_v19 = vld [vmem:[%s3602_s10 + $0x1] sm:$0x1] }
 0x34b   : > { %1802 = vmatpush.msrb.mxu2 %v2206_v20  ;;  %1724 = vmatpush.msrb.mxu1 %v2176_v23  ;;  %v1825_v23 = vld [vmem:[%s3604_s12] sm:$0x1] }
 0x34c   : > { %1763 = vmatpush.msrb.mxu0 %v2191_v21 }
 0x34d   : > { %1803 = vmatpush.msrb.mxu2 %v2205_v25  ;;  %1725 = vmatpush.msrb.mxu1 %v2175_v27 }
 0x34e   : > { %1764 = vmatpush.msrb.mxu0 %v2190_v24 }
 0x34f   : > { %1804 = vmatpush.msrb.mxu2 %v2204_v29  ;;  %1726 = vmatpush.msrb.mxu1 %v2174_v31 }
 0x350   : > { %1765 = vmatpush.msrb.mxu0 %v2189_v28 }
 0x351   : > { %1805 = vmatpush.msrb.mxu2 %v2203_v32  ;;  %1727 = vmatpush.msrb.mxu1 %v2173_v34 }
 0x352   : > { %1766 = vmatpush.msrb.mxu0 %v2188_v36 }
 0x353   : > { %1806 = vmatpush.msrb.mxu2 %v2202_v35  ;;  %1728 = vmatpush.msrb.mxu1 %v2172_v39 }
 0x354   : > { %1767 = vmatpush.msrb.mxu0 %v2187_v37 }
 0x355   : > { %1807 = vmatpush.msrb.mxu2 %v2201_v40  ;;  %1729 = vmatpush.msrb.mxu1 %v2171_v42 }
 0x356   : > { %1768 = vmatpush.msrb.mxu0 %v2186_v41 }
 0x357   : > { %1808 = vmatpush.msrb.mxu2 %v2200_v43  ;;  %1730 = vmatpush.msrb.mxu1 %v2170_v44 }
 0x358   : > { %1769 = vmatpush.msrb.mxu0 %v2185_v45 }
 0x359   : > { %1809 = vmatpush.msrb.mxu2 %v2199_v46  ;;  %1731 = vmatpush.msrb.mxu1 %v2169_v47 }
 0x35a   : > { %1770 = vmatpush.msrb.mxu0 %v2184_v48 }
 0x35b   : > { %1810 = vmatpush.msrb.mxu2 %v2198_v49  ;;  %1732 = vmatpush.msrb.mxu1 %v2168_v51 }
 0x35c   : > { %1771 = vmatpush.msrb.mxu0 %v2183_v50 }
 0x3bd   : > { %v1452_v52 = vpop.f32.mrf.mxu0  ;;  %v1472_v53 = vpop.f32.mrf.mxu1 }
 0x3be   : > { %v1473_v56 = vadd.f32 %v1472_v53, %v1452_v52 }
 0x3c2   : > { %v1521_v54 = vpop.f32.mrf.mxu3  ;;  %v1541_v55 = vpop.f32.mrf.mxu2 }
 0x3c3   : > { %v1542_v57 = vadd.f32 %v1541_v55, %v1521_v54 }
 0x3c5   : > { %v1544_v58 = vmax.f32 %v1473_v56, %v1542_v57 }
 0x3c7   : > { %v1636_v59 = vrot.slane %v1544_v58, 2  ;;  %v1575_v60 = vrot.slane %v1544_v58, 1  ;;  %v1675_v61 = vrot.slane %v1544_v58, 3  ;;  %2137 = vmatmul.msk.f32.vlgmr.msra.gmra.mxu0 %vm1576_vm7, %v1544_v58  ;;  %v1753_v62 = vrot.slane %v1544_v58, 5 }
 0x3c8   : > { %v1792_v63 = vrot.slane %v1544_v58, 6  ;;  %v1714_v0 = vrot.slane %v1544_v58, 4 }
 0x3c9   : > { %2152 = vmatmul.msk.f32.vlgmr.msra.gmra.mxu2 %vm1576_vm7, %v1636_v59  ;;  %2136 = vmatmul.msk.f32.vlgmr.msra.gmra.mxu1 %vm1576_vm7, %v1575_v60 }
 0x3ca   : > { %2167 = vmatmul.msk.f32.vlgmr.msra.gmra.mxu3 %vm1576_vm7, %v1675_v61 }
 0x3cf   : > { %2197 = vmatmul.msk.f32.vlgmr.msrb.gmra.mxu0 %vm1576_vm7, %v1753_v62 }
 0x3d1   : > { %2212 = vmatmul.msk.f32.vlgmr.msrb.gmra.mxu2 %vm1576_vm7, %v1792_v63  ;;  %2182 = vmatmul.msk.f32.vlgmr.msrb.gmra.mxu1 %vm1576_vm7, %v1714_v0 }
 0x444   : > { %v1618_v6 = vpop.f32.mrf.mxu0 }
 0x446   : > { %v1596_v5 = vpop.f32.mrf.mxu1 }
 0x447   : > { %v1619_v7 = vadd.f32 %v1618_v6, %v1596_v5 }
 0x44c   : > { %v1656_v8 = vpop.f32.mrf.mxu2  ;;  %v1773_v14 = vpop.f32.mrf.mxu0 }
 0x44d   : > { %v1659_v9 = vadd.f32 %v1656_v8, %v1619_v7  ;;  %v1695_v10 = vpop.f32.mrf.mxu3 }
 0x44e   : > { %v1734_v12 = vpop.f32.mrf.mxu1 }
 0x44f   : > { %v1698_v11 = vadd.f32 %v1695_v10, %v1659_v9 }
 0x451   : > { %v1737_v13 = vadd.f32 %v1734_v12, %v1698_v11 }
 0x453   : > { %v1776_v15 = vadd.f32 %v1773_v14, %v1737_v13 }
 0x454   : > { %v1812_v16 = vpop.f32.mrf.mxu2 }
 0x455   : > { %v1815_v18 = vadd.f32 %v1812_v16, %v1776_v15 }
 0x457   : > { %v1817_v20 = vmul.f32 %v1816_v17, %v1815_v18 }
 0x459   : > { %v1819_v21 = vadd.f32 %v1818_v19, %v1817_v20 }
 0x45b   : > { %v1820_v22 = vmax.f32 %v1819_v21, 0.0 }
 0x45d   : > { %2213 = vmatmul.msk.f32.vlgmr.msrb.gmra.mxu3 %vm1826_vm8, %v1820_v22 }
 0x4e0   : > { %v1847_v24 = vpop.f32.mrf.mxu3 }
 0x4e1   : > { %v1848_v25 = vadd.f32 %v1847_v24, %v1825_v23 }
 0x4e3   : > { %1850 = vst [vmem:[%s432_s23] sm:$0x1] %v1848_v25 }
 0x4e4   : > { %2283 = shalt.err (!%p2280_p3)
}
 0x4e5   : > { %2217 = dma.vmem_to_hbm [thread:$0]  (%p2428_p5), %s1863_s24, 16, %s1865_s14, %s1852_s15  }
 0x4e6 PF: > { %p2223_p4 = scmp.ge.s32.totalorder %s2318_s28, 2  ;;  %s1876_s16 = sand.u32 1, %s2306_s25  }
 0x4e7   : > { %s1877_s27 = scalar_lea.sflag [#allocation3], %s1876_s16 }
 0x4e8   : > { %p2220_p7 = pnand %p2223_p4, %p2432_p6 }
 0x4ea   : > { %p2221_p8 = pneg %p2220_p7 }
 0x4ec   : > { %2301 = dma.done.wait (%p2221_p8), %s1877_s27, 16  }
 0x4ed   : > { %2303 = vsyncadd (%p2221_p8), %s1877_s27, 4294967280  ;;  %s3616_s28 = sld [smem:[#allocation6_spill]]  ;;  %s3619_s25 = smov %s2310_s26 }
 0x4ee   : > { %s3617_s0 = sld [smem:[#allocation5_spill]] }
 0x4ef   : > { %s3618_s27 = sld [smem:[#allocation7_spill]] }
 0x4f3   : > { %p23_p9 = scmp.ge.s32.totalorder %s3616_s28, 4  }
 0x4f4   : > { %s3620_s26 = smov %s3617_s0 }
 0x4f5   :  { %25 = sbr.rel (!%p23_p9) target bundleno = 5 (0x5), region = 123 }
 0x4fa   :  { %1882 = vsyncpa [#allocation3], 1 }
 0x4fb   :  { %1884 = vsyncpa [#allocation3 + $0x1], 1 }

</bundles_post_ra>
